<compile_context>
chip_gen: v6e
topology: v6e:2x2x1
jax: 0.10.0
libtpu: 0.0.40
codegen_flags: <defaults>
</compile_context>

<pallas_src>
import functools

import jax
import jax.numpy as jnp
import numpy as np
from jax.experimental import pallas as pl
from jax.experimental.pallas import tpu as pltpu

IN_CH, OUT_CH, KH, KW = 4, 8, 2, 2
IMG = 7
CONV_OUT = IMG - KH + 1                  # 6
N_POS = CONV_OUT * CONV_OUT              # 36
PATCH = IN_CH * KH * KW                  # 16
PATCH_FLAT = N_POS * PATCH               # 576
CONV_FLAT = N_POS * OUT_CH               # 288
HID = 64
N_ACT = 4
EXTRA = N_ACT + 2                        # one-hot(4) + reward + done = 6
EXTRA_PAD = 8                            # pad tiny contraction dim to 8
GATES = 4 * HID                          # 256
HEAD_OUT = N_ACT + 1                     # 4 logits + 1 value
PACK = 128                               # lane-dense packed output width
SUB = 8                                  # sublane alignment


def _round_up(n, m):
    return ((n + m - 1) // m) * m


# ---------------------------------------------------------------------------
# The single fused Pallas kernel (one batch tile per grid step)
# ---------------------------------------------------------------------------
def fused_actor_critic_kernel(
        patches_ref, extras_ref, h0_ref, c0_ref,
        w_blk_ref, b_conv_ref, w_ihc_ref, w_ihe_ref, b_gate_ref,
        w_hh_ref, w_head_ref, b_head_ref,
        out_ref, hid_ref,
        gx_sc, feat_sc, *, seq_len, tile_b):
    rows = seq_len * tile_b

    # --- conv1 + ReLU for every (t, b) sample: block-diag im2col matmul ------
    patches = patches_ref[...].reshape(rows, PATCH_FLAT)           # bf16
    conv = jnp.maximum(
        jnp.dot(patches, w_blk_ref[...],
                preferred_element_type=jnp.float32) + b_conv_ref[...], 0.0)

    # --- hoisted input projection for ALL timesteps (one batched matmul) -----
    extras = extras_ref[...].reshape(rows, EXTRA_PAD)              # f32
    gx_sc[...] = (
        jnp.dot(conv.astype(jnp.bfloat16), w_ihc_ref[...],
                preferred_element_type=jnp.float32)
        + jnp.dot(extras, w_ihe_ref[...], preferred_element_type=jnp.float32)
        + b_gate_ref[...])

    w_hh = w_hh_ref[...]                                           # f32 (64,256)

    def step(t, carry):
        h, c = carry
        row = pl.multiple_of(t * tile_b, SUB)
        gates = gx_sc[pl.ds(row, tile_b), :] + jnp.dot(
            h, w_hh, preferred_element_type=jnp.float32)           # (tile_b,256)
        # sliced activations: sigmoid on i/f/o (192 lanes), tanh only on g (64)
        i_g = jax.nn.sigmoid(gates[:, 0 * HID:1 * HID])
        f_g = jax.nn.sigmoid(gates[:, 1 * HID:2 * HID])
        g_g = jnp.tanh(gates[:, 2 * HID:3 * HID])
        o_g = jax.nn.sigmoid(gates[:, 3 * HID:4 * HID])
        c_new = f_g * c + i_g * g_g
        h_new = o_g * jnp.tanh(c_new)
        feat_sc[pl.ds(row, tile_b), :] = h_new
        return h_new, c_new

    if seq_len <= 16:
        unroll = seq_len
    else:
        unroll = next(u for u in (8, 4, 2, 1) if seq_len % u == 0)
    h_fin, c_fin = jax.lax.fori_loop(0, seq_len, step,
                                     (h0_ref[...], c0_ref[...]),
                                     unroll=unroll)
    hid_ref[...] = jnp.concatenate([h_fin, c_fin], axis=-1)        # (tile_b,128)

    # --- fused pi + v heads on all T*tile_b feature rows at once -------------
    feats = feat_sc[...]                                           # (rows, 64)
    head = (jnp.dot(feats.astype(jnp.bfloat16), w_head_ref[...],
                    preferred_element_type=jnp.float32) + b_head_ref[...])
    logits = head[:, 0:N_ACT]
    vals = head[:, N_ACT:N_ACT + 1]
    m = jnp.max(logits, axis=-1, keepdims=True)
    e = jnp.exp(logits - m)
    probs = e / jnp.sum(e, axis=-1, keepdims=True)   # exact: probs sum to 1

    # single dense lane-packed store: [features | probs | value | zero pad]
    packed = jnp.concatenate(
        [feats, probs, vals,
         jnp.zeros((rows, PACK - HID - HEAD_OUT), jnp.float32)], axis=-1)
    out_ref[...] = packed.reshape(seq_len, tile_b, PACK)


# ---------------------------------------------------------------------------
# One-time parameter preparation (torch layouts -> kernel layouts)
# ---------------------------------------------------------------------------
def prepare_params(p):
    # conv as block-diagonal matmul over im2col patches (column order h,w,cin,khw)
    w_conv_kc = p["conv_w"].reshape(OUT_CH, PATCH).T                     # (16, 8)
    w_blk = jnp.kron(jnp.eye(N_POS, dtype=jnp.float32), w_conv_kc)       # (576, 288)
    b_conv = jnp.tile(p["conv_b"], N_POS).reshape(1, CONV_FLAT)

    # reorder torch NCHW conv-flatten rows (c*36+h*6+w) to our NHWC (h*48+w*8+c)
    perm = np.array([c * N_POS + h * CONV_OUT + w
                     for h in range(CONV_OUT)
                     for w in range(CONV_OUT)
                     for c in range(OUT_CH)], dtype=np.int32)
    w_ih_t = p["w_ih"].T                                                 # (294, 256)
    w_ih_conv = w_ih_t[:CONV_FLAT][perm]                                 # (288, 256)
    w_ih_extra = jnp.concatenate(
        [w_ih_t[CONV_FLAT:],
         jnp.zeros((EXTRA_PAD - EXTRA, GATES), jnp.float32)], axis=0)    # (8, 256)

    return dict(
        # bf16 operands for the big hoisted matmuls (MXU-native on all gens)
        w_blk=w_blk.astype(jnp.bfloat16),
        b_conv=b_conv,
        w_ih_conv=w_ih_conv.astype(jnp.bfloat16),
        w_ih_extra=w_ih_extra,                                           # f32 (tiny)
        b_gate=(p["b_ih"] + p["b_hh"]).reshape(1, GATES),
        # recurrent path stays f32 (critical path, avoids state drift)
        w_hh_t=p["w_hh"].T,                                              # (64, 256)
        w_head=jnp.concatenate([p["w_pi"].T, p["w_v"].T],
                               axis=1).astype(jnp.bfloat16),             # (64, 5)
        b_head=jnp.concatenate([p["b_pi"], p["b_v"]]).reshape(1, HEAD_OUT),
    )


# ---------------------------------------------------------------------------
# Fused forward (single pallas_call) + thin public entry points
# ---------------------------------------------------------------------------
def _pick_tile_b(B, T):
    # bound per-tile rows so double-buffered DMAs + scratch stay well under
    # default scoped-VMEM limits (16 MiB on v5e) and v7x's 64 MiB physical.
    max_rows = 2048
    cap = max(SUB, (max_rows // max(T, 1)) // SUB * SUB)
    return int(min(_round_up(B, SUB), cap, 256))


@jax.jit
def _fused_forward(prep, x, hidden, prev_action, prev_reward, prev_done):
    squeeze_t = (x.ndim == 4)
    if squeeze_t:
        x = x[:, None]
        prev_action = prev_action[:, None]
        prev_reward = prev_reward[:, None]
        prev_done = prev_done[:, None]
    B, T = x.shape[0], x.shape[1]
    tile_b = _pick_tile_b(B, T)
    Bp = _round_up(B, tile_b)
    pad_b = Bp - B
    n_tiles = Bp // tile_b

    # time-major im2col patches: (T, B, 576)
    x_tb = jnp.swapaxes(x, 0, 1).astype(jnp.float32)                 # (T, B, 7, 7, 4)
    cols = [x_tb[:, :, kh:kh + CONV_OUT, kw:kw + CONV_OUT, :]
            for kh in range(KH) for kw in range(KW)]
    patches = jnp.stack(cols, axis=-1).reshape(T, B, PATCH_FLAT)
    # TODO(synk): at large T*B build patches in-kernel from raw NHWC (per-tap
    # slices) to cut HBM reads ~3x and switch the block-diag conv to per-tap
    # matmuls; not worth the in-kernel lane relayout at small batch.

    one_hot = jax.nn.one_hot(prev_action, N_ACT, dtype=jnp.float32)  # (B, T, 4)
    extras = jnp.concatenate(
        [one_hot,
         prev_reward[..., None].astype(jnp.float32),
         prev_done[..., None].astype(jnp.float32),
         jnp.zeros((B, T, EXTRA_PAD - EXTRA), jnp.float32)], axis=-1)
    extras = jnp.swapaxes(extras, 0, 1)                              # (T, B, 8)
    # TODO(synk): fold extras construction into the kernel for the T=1 path.

    patches = jnp.pad(patches, ((0, 0), (0, pad_b), (0, 0))).astype(jnp.bfloat16)
    extras = jnp.pad(extras, ((0, 0), (0, pad_b), (0, 0)))
    h0 = jnp.pad(hidden[:, :HID], ((0, pad_b), (0, 0)))
    c0 = jnp.pad(hidden[:, HID:], ((0, pad_b), (0, 0)))

    def full(shape):
        return pl.BlockSpec(shape, lambda i: (0,) * len(shape))

    out_packed, hid_out = pl.pallas_call(
        functools.partial(fused_actor_critic_kernel, seq_len=T, tile_b=tile_b),
        out_shape=(jax.ShapeDtypeStruct((T, Bp, PACK), jnp.float32),
                   jax.ShapeDtypeStruct((Bp, 2 * HID), jnp.float32)),
        grid=(n_tiles,),
        in_specs=[
            pl.BlockSpec((T, tile_b, PATCH_FLAT), lambda i: (0, i, 0)),
            pl.BlockSpec((T, tile_b, EXTRA_PAD), lambda i: (0, i, 0)),
            pl.BlockSpec((tile_b, HID), lambda i: (i, 0)),
            pl.BlockSpec((tile_b, HID), lambda i: (i, 0)),
            full((PATCH_FLAT, CONV_FLAT)),      # w_blk (bf16, resident)
            full((1, CONV_FLAT)),               # b_conv
            full((CONV_FLAT, GATES)),           # w_ih_conv (bf16)
            full((EXTRA_PAD, GATES)),           # w_ih_extra
            full((1, GATES)),                   # b_gate
            full((HID, GATES)),                 # w_hh (f32)
            full((HID, HEAD_OUT)),              # w_head (bf16)
            full((1, HEAD_OUT)),                # b_head
        ],
        out_specs=(pl.BlockSpec((T, tile_b, PACK), lambda i: (0, i, 0)),
                   pl.BlockSpec((tile_b, 2 * HID), lambda i: (i, 0))),
        scratch_shapes=[pltpu.VMEM((T * tile_b, GATES), jnp.float32),
                        pltpu.VMEM((T * tile_b, HID), jnp.float32)],
        compiler_params=pltpu.CompilerParams(
            dimension_semantics=("parallel",),
            vmem_limit_bytes=48 * 1024 * 1024),
    )(patches, extras, h0, c0,
      prep["w_blk"], prep["b_conv"], prep["w_ih_conv"], prep["w_ih_extra"],
      prep["b_gate"], prep["w_hh_t"], prep["w_head"], prep["b_head"])

    out_packed = jnp.swapaxes(out_packed[:, :B], 0, 1)               # (B, T, 128)
    features = out_packed[..., :HID]                                 # (B, T, 64)
    probs = out_packed[..., HID:HID + N_ACT]                         # (B, T, 4)
    values = out_packed[..., HID + N_ACT:HID + N_ACT + 1]            # (B, T, 1)
    hidden_out = hid_out[:B]                                         # (B, 128)
    if squeeze_t:
        features = features[:, 0]
        probs = probs[:, 0]
        values = values[:, 0]
    return features, probs, values, hidden_out


def actor_critic_forward(prep, x, hidden, prev_action, prev_reward, prev_done):
    features, _, _, hidden_out = _fused_forward(
        prep, x, hidden, prev_action, prev_reward, prev_done)
    return features, hidden_out


def actor_critic_pi(prep, x, hidden, prev_action, prev_reward, prev_done):
    _, probs, _, hidden_out = _fused_forward(
        prep, x, hidden, prev_action, prev_reward, prev_done)
    return probs, hidden_out


def actor_critic_v(prep, x, hidden, prev_action, prev_reward, prev_done):
    _, _, values, _ = _fused_forward(
        prep, x, hidden, prev_action, prev_reward, prev_done)
    return values


def actor_critic_pi_v(prep, x, hidden, prev_action, prev_reward, prev_done):
    """Combined entry point: one forward pass yields probs, values, memory."""
    _, probs, values, hidden_out = _fused_forward(
        prep, x, hidden, prev_action, prev_reward, prev_done)
    return probs, values, hidden_out


# ---------------------------------------------------------------------------
# Deterministic parameter init (torch layouts)
# ---------------------------------------------------------------------------
def init_params(key):
    ks = jax.random.split(key, 12)
    s = 0.1
    return dict(
        conv_w=jax.random.normal(ks[0], (OUT_CH, IN_CH, KH, KW), jnp.float32) * s,
        conv_b=jax.random.normal(ks[1], (OUT_CH,), jnp.float32) * s,
        # fc1 exists in the torch module but is never used in its forward pass.
        fc1_w=jax.random.normal(ks[2], (64, CONV_FLAT), jnp.float32) * s,
        fc1_b=jax.random.normal(ks[3], (64,), jnp.float32) * s,
        w_ih=jax.random.normal(ks[4], (4 * HID, CONV_FLAT + EXTRA), jnp.float32) * (s * 0.5),
        w_hh=jax.random.normal(ks[5], (4 * HID, HID), jnp.float32) * s,
        b_ih=jax.random.normal(ks[6], (4 * HID,), jnp.float32) * s,
        b_hh=jax.random.normal(ks[7], (4 * HID,), jnp.float32) * s,
        w_pi=jax.random.normal(ks[8], (N_ACT, HID), jnp.float32) * s,
        b_pi=jax.random.normal(ks[9], (N_ACT,), jnp.float32) * s,
        w_v=jax.random.normal(ks[10], (1, HID), jnp.float32) * s,
        b_v=jax.random.normal(ks[11], (1,), jnp.float32) * s,
    )


# ---------------------------------------------------------------------------
# Pure-JAX reference (mirrors the torch forward exactly) for validation
# ---------------------------------------------------------------------------
def _ref_forward(params, x, hidden, prev_action, prev_reward, prev_done):
    reshaped = x.ndim == 5
    if reshaped:
        B, T = x.shape[0], x.shape[1]
        x = x.reshape(B * T, *x.shape[2:])
        prev_action = prev_action.reshape(-1)
        prev_reward = prev_reward.reshape(-1)
        prev_done = prev_done.reshape(-1)
    else:
        B, T = x.shape[0], 1
    N = x.shape[0]
    xc = jnp.transpose(x, (0, 3, 1, 2))
    conv = jax.lax.conv_general_dilated(
        xc, params["conv_w"], (1, 1), "VALID",
        dimension_numbers=("NCHW", "OIHW", "NCHW"))
    conv = jax.nn.relu(conv + params["conv_b"][None, :, None, None]).reshape(N, -1)
    oh = jax.nn.one_hot(prev_action, N_ACT, dtype=jnp.float32)
    feat = jnp.concatenate([conv, oh, prev_reward[:, None].astype(jnp.float32),
                            prev_done[:, None].astype(jnp.float32)], axis=-1)
    feat = feat.reshape(B, T, -1)
    h, c = hidden[:, :HID], hidden[:, HID:]
    outs = []
    for t in range(T):
        g = (feat[:, t] @ params["w_ih"].T + params["b_ih"]
             + h @ params["w_hh"].T + params["b_hh"])
        i_g, f_g, g_g, o_g = jnp.split(g, 4, axis=-1)
        c = jax.nn.sigmoid(f_g) * c + jax.nn.sigmoid(i_g) * jnp.tanh(g_g)
        h = jax.nn.sigmoid(o_g) * jnp.tanh(c)
        outs.append(h)
    features = jnp.stack(outs, axis=1)
    if T == 1:
        features = features[:, 0]
    return features, jnp.concatenate([h, c], axis=1)


if __name__ == "__main__":
    key = jax.random.PRNGKey(0)
    pkey, xkey, hkey, akey, rkey, dkey = jax.random.split(key, 6)
    params = init_params(pkey)
    prep = prepare_params(params)

    B, T = 2, 3
    x = jax.random.normal(xkey, (B, T, IMG, IMG, IN_CH), jnp.float32)
    hidden = jax.random.normal(hkey, (B, 2 * HID), jnp.float32) * 0.1
    prev_action = jax.random.randint(akey, (B, T), 0, N_ACT)
    prev_reward = jax.random.normal(rkey, (B, T), jnp.float32)
    prev_done = (jax.random.uniform(dkey, (B, T)) > 0.5).astype(jnp.float32)

    # combined path: conv + LSTM + both heads in ONE fused pallas_call
    prob, value, memory = actor_critic_pi_v(
        prep, x, hidden, prev_action, prev_reward, prev_done)
    jax.block_until_ready((prob, value, memory))

    # validate against pure-JAX reference
    ref_feat, ref_mem = _ref_forward(params, x, hidden, prev_action, prev_reward, prev_done)
    ref_prob = jax.nn.softmax(ref_feat @ params["w_pi"].T + params["b_pi"], axis=-1)
    ref_v = ref_feat @ params["w_v"].T + params["b_v"]
    np.testing.assert_allclose(np.asarray(prob), np.asarray(ref_prob), atol=2e-2, rtol=2e-2)
    np.testing.assert_allclose(np.asarray(memory), np.asarray(ref_mem), atol=2e-2, rtol=2e-2)
    np.testing.assert_allclose(np.asarray(value), np.asarray(ref_v), atol=2e-2, rtol=2e-2)

    # individual pi / v entry points (each is still a single fused kernel call)
    prob_b, mem_b = actor_critic_pi(prep, x, hidden, prev_action, prev_reward, prev_done)
    val_b = actor_critic_v(prep, x, hidden, prev_action, prev_reward, prev_done)
    np.testing.assert_allclose(np.asarray(prob_b), np.asarray(ref_prob), atol=2e-2, rtol=2e-2)
    np.testing.assert_allclose(np.asarray(val_b), np.asarray(ref_v), atol=2e-2, rtol=2e-2)

    # single-step (4-D input, T == 1, squeeze) path
    prob1, val1, mem1 = actor_critic_pi_v(prep, x[:, 0], hidden, prev_action[:, 0],
                                          prev_reward[:, 0], prev_done[:, 0])
    jax.block_until_ready((prob1, val1, mem1))
    assert prob1.shape == (B, N_ACT) and mem1.shape == (B, 2 * HID) and val1.shape == (B, 1)
    ref_f1, ref_m1 = _ref_forward(params, x[:, 0], hidden, prev_action[:, 0],
                                  prev_reward[:, 0], prev_done[:, 0])
    ref_p1 = jax.nn.softmax(ref_f1 @ params["w_pi"].T + params["b_pi"], axis=-1)
    np.testing.assert_allclose(np.asarray(prob1), np.asarray(ref_p1), atol=2e-2, rtol=2e-2)
    np.testing.assert_allclose(np.asarray(mem1), np.asarray(ref_m1), atol=2e-2, rtol=2e-2)

    print("KERNEL_OK")
</pallas_src>

<mosaic_0001>
module attributes {stable_mosaic.version = 11 : i64} {
  func.func @fused_actor_critic_kernel(%arg0: i32, %arg1: memref<3x8x576xbf16, #tpu.memory_space<vmem>>, %arg2: memref<3x8x8xf32, #tpu.memory_space<vmem>>, %arg3: memref<8x64xf32, #tpu.memory_space<vmem>>, %arg4: memref<8x64xf32, #tpu.memory_space<vmem>>, %arg5: memref<576x288xbf16, #tpu.memory_space<vmem>>, %arg6: memref<1x288xf32, #tpu.memory_space<vmem>>, %arg7: memref<288x256xbf16, #tpu.memory_space<vmem>>, %arg8: memref<8x256xf32, #tpu.memory_space<vmem>>, %arg9: memref<1x256xf32, #tpu.memory_space<vmem>>, %arg10: memref<64x256xf32, #tpu.memory_space<vmem>>, %arg11: memref<64x5xbf16, #tpu.memory_space<vmem>>, %arg12: memref<1x5xf32, #tpu.memory_space<vmem>>, %arg13: memref<3x8x128xf32, #tpu.memory_space<vmem>>, %arg14: memref<8x128xf32, #tpu.memory_space<vmem>>, %arg15: memref<24x256xf32, #tpu.memory_space<vmem>>, %arg16: memref<24x64xf32, #tpu.memory_space<vmem>>) attributes {dimension_semantics = [#tpu.dimension_semantics<parallel>], iteration_bounds = array<i64: 1>, scalar_prefetch = 0 : i64, scratch_operands = 2 : i64, tpu.core_type = #tpu.core_type<tc>, window_params = [{transform_indices = @transform_0, window_bounds = array<i64: 3, 8, 576>}, {transform_indices = @transform_1, window_bounds = array<i64: 3, 8, 8>}, {transform_indices = @transform_2, window_bounds = array<i64: 8, 64>}, {transform_indices = @transform_3, window_bounds = array<i64: 8, 64>}, {pipeline_mode = #tpu.pipeline_mode<synchronous>, transform_indices = @transform_4, window_bounds = array<i64: 576, 288>}, {pipeline_mode = #tpu.pipeline_mode<synchronous>, transform_indices = @transform_5, window_bounds = array<i64: 1, 288>}, {pipeline_mode = #tpu.pipeline_mode<synchronous>, transform_indices = @transform_6, window_bounds = array<i64: 288, 256>}, {pipeline_mode = #tpu.pipeline_mode<synchronous>, transform_indices = @transform_7, window_bounds = array<i64: 8, 256>}, {pipeline_mode = #tpu.pipeline_mode<synchronous>, transform_indices = @transform_8, window_bounds = array<i64: 1, 256>}, {pipeline_mode = #tpu.pipeline_mode<synchronous>, transform_indices = @transform_9, window_bounds = array<i64: 64, 256>}, {pipeline_mode = #tpu.pipeline_mode<synchronous>, transform_indices = @transform_10, window_bounds = array<i64: 64, 5>}, {pipeline_mode = #tpu.pipeline_mode<synchronous>, transform_indices = @transform_11, window_bounds = array<i64: 1, 5>}, {transform_indices = @transform_12, window_bounds = array<i64: 3, 8, 128>}, {transform_indices = @transform_13, window_bounds = array<i64: 8, 128>}]} {
    %c0 = arith.constant 0 : index
    %c0_0 = arith.constant 0 : index
    %c0_1 = arith.constant 0 : index
    %0 = vector.load %arg1[%c0, %c0_0, %c0_1] : memref<3x8x576xbf16, #tpu.memory_space<vmem>>, vector<3x8x576xbf16>
    %1 = vector.shape_cast %0 : vector<3x8x576xbf16> to vector<24x576xbf16>
    %c0_2 = arith.constant 0 : index
    %c0_3 = arith.constant 0 : index
    %2 = vector.load %arg5[%c0_2, %c0_3] : memref<576x288xbf16, #tpu.memory_space<vmem>>, vector<576x288xbf16>
    %cst = arith.constant dense<0.000000e+00> : vector<24x288xf32>
    %3 = tpu.matmul %1, %2, %cst {dimension_numbers = #tpu.dot_dimension_numbers<[1], [0], [0], [1], [0, 0, 1, 1], [], []>} : vector<24x576xbf16>, vector<576x288xbf16>, vector<24x288xf32> -> vector<24x288xf32>
    %c0_4 = arith.constant 0 : index
    %c0_5 = arith.constant 0 : index
    %4 = vector.load %arg6[%c0_4, %c0_5] : memref<1x288xf32, #tpu.memory_space<vmem>>, vector<1x288xf32>
    %5 = vector.broadcast %4 : vector<1x288xf32> to vector<24x288xf32>
    %6 = arith.addf %3, %5 : vector<24x288xf32>
    %cst_6 = arith.constant 0.000000e+00 : f32
    %7 = vector.broadcast %cst_6 : f32 to vector<24x288xf32>
    %8 = arith.maximumf %6, %7 : vector<24x288xf32>
    %c0_7 = arith.constant 0 : index
    %c0_8 = arith.constant 0 : index
    %c0_9 = arith.constant 0 : index
    %9 = vector.load %arg2[%c0_7, %c0_8, %c0_9] : memref<3x8x8xf32, #tpu.memory_space<vmem>>, vector<3x8x8xf32>
    %10 = vector.shape_cast %9 : vector<3x8x8xf32> to vector<24x8xf32>
    %11 = arith.truncf %8 : vector<24x288xf32> to vector<24x288xbf16>
    %c0_10 = arith.constant 0 : index
    %c0_11 = arith.constant 0 : index
    %12 = vector.load %arg7[%c0_10, %c0_11] : memref<288x256xbf16, #tpu.memory_space<vmem>>, vector<288x256xbf16>
    %cst_12 = arith.constant dense<0.000000e+00> : vector<24x256xf32>
    %13 = tpu.matmul %11, %12, %cst_12 {dimension_numbers = #tpu.dot_dimension_numbers<[1], [0], [0], [1], [0, 0, 1, 1], [], []>} : vector<24x288xbf16>, vector<288x256xbf16>, vector<24x256xf32> -> vector<24x256xf32>
    %c0_13 = arith.constant 0 : index
    %c0_14 = arith.constant 0 : index
    %14 = vector.load %arg8[%c0_13, %c0_14] : memref<8x256xf32, #tpu.memory_space<vmem>>, vector<8x256xf32>
    %cst_15 = arith.constant dense<0.000000e+00> : vector<24x256xf32>
    %15 = tpu.matmul %10, %14, %cst_15 {dimension_numbers = #tpu.dot_dimension_numbers<[1], [0], [0], [1], [0, 0, 1, 1], [], []>} : vector<24x8xf32>, vector<8x256xf32>, vector<24x256xf32> -> vector<24x256xf32>
    %16 = arith.addf %13, %15 : vector<24x256xf32>
    %c0_16 = arith.constant 0 : index
    %c0_17 = arith.constant 0 : index
    %17 = vector.load %arg9[%c0_16, %c0_17] : memref<1x256xf32, #tpu.memory_space<vmem>>, vector<1x256xf32>
    %18 = vector.broadcast %17 : vector<1x256xf32> to vector<24x256xf32>
    %19 = arith.addf %16, %18 : vector<24x256xf32>
    %c0_18 = arith.constant 0 : index
    %c0_19 = arith.constant 0 : index
    %20 = vector.load %arg15[%c0_18, %c0_19] : memref<24x256xf32, #tpu.memory_space<vmem>>, vector<24x256xf32>
    tpu.vector_store %arg15[%c0_18, %c0_19], %19 {strides = array<i32>} : memref<24x256xf32, #tpu.memory_space<vmem>>, vector<24x256xf32>,
    %c0_20 = arith.constant 0 : index
    %c0_21 = arith.constant 0 : index
    %21 = vector.load %arg10[%c0_20, %c0_21] : memref<64x256xf32, #tpu.memory_space<vmem>>, vector<64x256xf32>
    %c0_22 = arith.constant 0 : index
    %c0_23 = arith.constant 0 : index
    %22 = vector.load %arg3[%c0_22, %c0_23] : memref<8x64xf32, #tpu.memory_space<vmem>>, vector<8x64xf32>
    %c0_24 = arith.constant 0 : index
    %c0_25 = arith.constant 0 : index
    %23 = vector.load %arg4[%c0_24, %c0_25] : memref<8x64xf32, #tpu.memory_space<vmem>>, vector<8x64xf32>
    %c0_i32 = arith.constant 0 : i32
    %c8_i32 = arith.constant 8 : i32
    %24 = arith.muli %c0_i32, %c8_i32 : i32
    %25 = tpu.assume_multiple %24, 8 : i32
    %26 = arith.index_cast %25 : i32 to index
    %c0_26 = arith.constant 0 : index
    %27 = vector.load %arg15[%26, %c0_26] : memref<24x256xf32, #tpu.memory_space<vmem>>, vector<8x256xf32>
    %cst_27 = arith.constant dense<0.000000e+00> : vector<8x256xf32>
    %28 = tpu.matmul %22, %21, %cst_27 {dimension_numbers = #tpu.dot_dimension_numbers<[1], [0], [0], [1], [0, 0, 1, 1], [], []>} : vector<8x64xf32>, vector<64x256xf32>, vector<8x256xf32> -> vector<8x256xf32>
    %29 = arith.addf %27, %28 : vector<8x256xf32>
    %30 = vector.extract_strided_slice %29 {offsets = [0, 0], sizes = [8, 64], strides = [1, 1]} : vector<8x256xf32> to vector<8x64xf32>
    %31 = arith.negf %30 : vector<8x64xf32>
    %32 = math.exp %31 : vector<8x64xf32>
    %cst_28 = arith.constant 1.000000e+00 : f32
    %33 = vector.broadcast %cst_28 : f32 to vector<8x64xf32>
    %34 = arith.addf %33, %32 : vector<8x64xf32>
    %35 = arith.divf %33, %34 : vector<8x64xf32>
    %36 = vector.extract_strided_slice %29 {offsets = [0, 64], sizes = [8, 64], strides = [1, 1]} : vector<8x256xf32> to vector<8x64xf32>
    %37 = arith.negf %36 : vector<8x64xf32>
    %38 = math.exp %37 : vector<8x64xf32>
    %cst_29 = arith.constant 1.000000e+00 : f32
    %39 = vector.broadcast %cst_29 : f32 to vector<8x64xf32>
    %40 = arith.addf %39, %38 : vector<8x64xf32>
    %41 = arith.divf %39, %40 : vector<8x64xf32>
    %42 = vector.extract_strided_slice %29 {offsets = [0, 128], sizes = [8, 64], strides = [1, 1]} : vector<8x256xf32> to vector<8x64xf32>
    %43 = math.tanh %42 : vector<8x64xf32>
    %44 = vector.extract_strided_slice %29 {offsets = [0, 192], sizes = [8, 64], strides = [1, 1]} : vector<8x256xf32> to vector<8x64xf32>
    %45 = arith.negf %44 : vector<8x64xf32>
    %46 = math.exp %45 : vector<8x64xf32>
    %cst_30 = arith.constant 1.000000e+00 : f32
    %47 = vector.broadcast %cst_30 : f32 to vector<8x64xf32>
    %48 = arith.addf %47, %46 : vector<8x64xf32>
    %49 = arith.divf %47, %48 : vector<8x64xf32>
    %50 = arith.mulf %41, %23 : vector<8x64xf32>
    %51 = arith.mulf %35, %43 : vector<8x64xf32>
    %52 = arith.addf %50, %51 : vector<8x64xf32>
    %53 = math.tanh %52 : vector<8x64xf32>
    %54 = arith.mulf %49, %53 : vector<8x64xf32>
    %55 = arith.index_cast %25 : i32 to index
    %c0_31 = arith.constant 0 : index
    %56 = vector.load %arg16[%55, %c0_31] : memref<24x64xf32, #tpu.memory_space<vmem>>, vector<8x64xf32>
    tpu.vector_store %arg16[%55, %c0_31], %54 {strides = array<i32>} : memref<24x64xf32, #tpu.memory_space<vmem>>, vector<8x64xf32>,
    %c1_i32 = arith.constant 1 : i32
    %c8_i32_32 = arith.constant 8 : i32
    %57 = arith.muli %c1_i32, %c8_i32_32 : i32
    %58 = tpu.assume_multiple %57, 8 : i32
    %59 = arith.index_cast %58 : i32 to index
    %c0_33 = arith.constant 0 : index
    %60 = vector.load %arg15[%59, %c0_33] : memref<24x256xf32, #tpu.memory_space<vmem>>, vector<8x256xf32>
    %cst_34 = arith.constant dense<0.000000e+00> : vector<8x256xf32>
    %61 = tpu.matmul %54, %21, %cst_34 {dimension_numbers = #tpu.dot_dimension_numbers<[1], [0], [0], [1], [0, 0, 1, 1], [], []>} : vector<8x64xf32>, vector<64x256xf32>, vector<8x256xf32> -> vector<8x256xf32>
    %62 = arith.addf %60, %61 : vector<8x256xf32>
    %63 = vector.extract_strided_slice %62 {offsets = [0, 0], sizes = [8, 64], strides = [1, 1]} : vector<8x256xf32> to vector<8x64xf32>
    %64 = arith.negf %63 : vector<8x64xf32>
    %65 = math.exp %64 : vector<8x64xf32>
    %cst_35 = arith.constant 1.000000e+00 : f32
    %66 = vector.broadcast %cst_35 : f32 to vector<8x64xf32>
    %67 = arith.addf %66, %65 : vector<8x64xf32>
    %68 = arith.divf %66, %67 : vector<8x64xf32>
    %69 = vector.extract_strided_slice %62 {offsets = [0, 64], sizes = [8, 64], strides = [1, 1]} : vector<8x256xf32> to vector<8x64xf32>
    %70 = arith.negf %69 : vector<8x64xf32>
    %71 = math.exp %70 : vector<8x64xf32>
    %cst_36 = arith.constant 1.000000e+00 : f32
    %72 = vector.broadcast %cst_36 : f32 to vector<8x64xf32>
    %73 = arith.addf %72, %71 : vector<8x64xf32>
    %74 = arith.divf %72, %73 : vector<8x64xf32>
    %75 = vector.extract_strided_slice %62 {offsets = [0, 128], sizes = [8, 64], strides = [1, 1]} : vector<8x256xf32> to vector<8x64xf32>
    %76 = math.tanh %75 : vector<8x64xf32>
    %77 = vector.extract_strided_slice %62 {offsets = [0, 192], sizes = [8, 64], strides = [1, 1]} : vector<8x256xf32> to vector<8x64xf32>
    %78 = arith.negf %77 : vector<8x64xf32>
    %79 = math.exp %78 : vector<8x64xf32>
    %cst_37 = arith.constant 1.000000e+00 : f32
    %80 = vector.broadcast %cst_37 : f32 to vector<8x64xf32>
    %81 = arith.addf %80, %79 : vector<8x64xf32>
    %82 = arith.divf %80, %81 : vector<8x64xf32>
    %83 = arith.mulf %74, %52 : vector<8x64xf32>
    %84 = arith.mulf %68, %76 : vector<8x64xf32>
    %85 = arith.addf %83, %84 : vector<8x64xf32>
    %86 = math.tanh %85 : vector<8x64xf32>
    %87 = arith.mulf %82, %86 : vector<8x64xf32>
    %88 = arith.index_cast %58 : i32 to index
    %c0_38 = arith.constant 0 : index
    %89 = vector.load %arg16[%88, %c0_38] : memref<24x64xf32, #tpu.memory_space<vmem>>, vector<8x64xf32>
    tpu.vector_store %arg16[%88, %c0_38], %87 {strides = array<i32>} : memref<24x64xf32, #tpu.memory_space<vmem>>, vector<8x64xf32>,
    %c2_i32 = arith.constant 2 : i32
    %c8_i32_39 = arith.constant 8 : i32
    %90 = arith.muli %c2_i32, %c8_i32_39 : i32
    %91 = tpu.assume_multiple %90, 8 : i32
    %92 = arith.index_cast %91 : i32 to index
    %c0_40 = arith.constant 0 : index
    %93 = vector.load %arg15[%92, %c0_40] : memref<24x256xf32, #tpu.memory_space<vmem>>, vector<8x256xf32>
    %cst_41 = arith.constant dense<0.000000e+00> : vector<8x256xf32>
    %94 = tpu.matmul %87, %21, %cst_41 {dimension_numbers = #tpu.dot_dimension_numbers<[1], [0], [0], [1], [0, 0, 1, 1], [], []>} : vector<8x64xf32>, vector<64x256xf32>, vector<8x256xf32> -> vector<8x256xf32>
    %95 = arith.addf %93, %94 : vector<8x256xf32>
    %96 = vector.extract_strided_slice %95 {offsets = [0, 0], sizes = [8, 64], strides = [1, 1]} : vector<8x256xf32> to vector<8x64xf32>
    %97 = arith.negf %96 : vector<8x64xf32>
    %98 = math.exp %97 : vector<8x64xf32>
    %cst_42 = arith.constant 1.000000e+00 : f32
    %99 = vector.broadcast %cst_42 : f32 to vector<8x64xf32>
    %100 = arith.addf %99, %98 : vector<8x64xf32>
    %101 = arith.divf %99, %100 : vector<8x64xf32>
    %102 = vector.extract_strided_slice %95 {offsets = [0, 64], sizes = [8, 64], strides = [1, 1]} : vector<8x256xf32> to vector<8x64xf32>
    %103 = arith.negf %102 : vector<8x64xf32>
    %104 = math.exp %103 : vector<8x64xf32>
    %cst_43 = arith.constant 1.000000e+00 : f32
    %105 = vector.broadcast %cst_43 : f32 to vector<8x64xf32>
    %106 = arith.addf %105, %104 : vector<8x64xf32>
    %107 = arith.divf %105, %106 : vector<8x64xf32>
    %108 = vector.extract_strided_slice %95 {offsets = [0, 128], sizes = [8, 64], strides = [1, 1]} : vector<8x256xf32> to vector<8x64xf32>
    %109 = math.tanh %108 : vector<8x64xf32>
    %110 = vector.extract_strided_slice %95 {offsets = [0, 192], sizes = [8, 64], strides = [1, 1]} : vector<8x256xf32> to vector<8x64xf32>
    %111 = arith.negf %110 : vector<8x64xf32>
    %112 = math.exp %111 : vector<8x64xf32>
    %cst_44 = arith.constant 1.000000e+00 : f32
    %113 = vector.broadcast %cst_44 : f32 to vector<8x64xf32>
    %114 = arith.addf %113, %112 : vector<8x64xf32>
    %115 = arith.divf %113, %114 : vector<8x64xf32>
    %116 = arith.mulf %107, %85 : vector<8x64xf32>
    %117 = arith.mulf %101, %109 : vector<8x64xf32>
    %118 = arith.addf %116, %117 : vector<8x64xf32>
    %119 = math.tanh %118 : vector<8x64xf32>
    %120 = arith.mulf %115, %119 : vector<8x64xf32>
    %121 = arith.index_cast %91 : i32 to index
    %c0_45 = arith.constant 0 : index
    %122 = vector.load %arg16[%121, %c0_45] : memref<24x64xf32, #tpu.memory_space<vmem>>, vector<8x64xf32>
    tpu.vector_store %arg16[%121, %c0_45], %120 {strides = array<i32>} : memref<24x64xf32, #tpu.memory_space<vmem>>, vector<8x64xf32>,
    %c3_i32 = arith.constant 3 : i32
    %123 = tpu.concatenate %120, %118 in 1 : vector<8x64xf32>, vector<8x64xf32> -> vector<8x128xf32>
    %c0_46 = arith.constant 0 : index
    %c0_47 = arith.constant 0 : index
    %124 = vector.load %arg14[%c0_46, %c0_47] : memref<8x128xf32, #tpu.memory_space<vmem>>, vector<8x128xf32>
    tpu.vector_store %arg14[%c0_46, %c0_47], %123 {strides = array<i32>} : memref<8x128xf32, #tpu.memory_space<vmem>>, vector<8x128xf32>,
    %c0_48 = arith.constant 0 : index
    %c0_49 = arith.constant 0 : index
    %125 = vector.load %arg16[%c0_48, %c0_49] : memref<24x64xf32, #tpu.memory_space<vmem>>, vector<24x64xf32>
    %126 = arith.truncf %125 : vector<24x64xf32> to vector<24x64xbf16>
    %c0_50 = arith.constant 0 : index
    %c0_51 = arith.constant 0 : index
    %127 = vector.load %arg11[%c0_50, %c0_51] : memref<64x5xbf16, #tpu.memory_space<vmem>>, vector<64x5xbf16>
    %cst_52 = arith.constant dense<0.000000e+00> : vector<24x5xf32>
    %128 = tpu.matmul %126, %127, %cst_52 {dimension_numbers = #tpu.dot_dimension_numbers<[1], [0], [0], [1], [0, 0, 1, 1], [], []>} : vector<24x64xbf16>, vector<64x5xbf16>, vector<24x5xf32> -> vector<24x5xf32>
    %c0_53 = arith.constant 0 : index
    %c0_54 = arith.constant 0 : index
    %129 = vector.load %arg12[%c0_53, %c0_54] : memref<1x5xf32, #tpu.memory_space<vmem>>, vector<1x5xf32>
    %130 = vector.broadcast %129 : vector<1x5xf32> to vector<24x5xf32>
    %131 = arith.addf %128, %130 : vector<24x5xf32>
    %132 = vector.extract_strided_slice %131 {offsets = [0, 0], sizes = [24, 4], strides = [1, 1]} : vector<24x5xf32> to vector<24x4xf32>
    %133 = vector.extract_strided_slice %131 {offsets = [0, 4], sizes = [24, 1], strides = [1, 1]} : vector<24x5xf32> to vector<24x1xf32>
    %cst_55 = arith.constant dense<0xFF800000> : vector<24xf32>
    %134 = vector.multi_reduction <maximumf>, %132, %cst_55 [1] : vector<24x4xf32> to vector<24xf32>
    %135 = vector.shape_cast %134 : vector<24xf32> to vector<24x1xf32>
    %136 = vector.broadcast %135 : vector<24x1xf32> to vector<24x4xf32>
    %137 = arith.subf %132, %136 : vector<24x4xf32>
    %138 = math.exp %137 : vector<24x4xf32>
    %cst_56 = arith.constant dense<0.000000e+00> : vector<24xf32>
    %139 = vector.multi_reduction <add>, %138, %cst_56 [1] : vector<24x4xf32> to vector<24xf32>
    %140 = vector.shape_cast %139 : vector<24xf32> to vector<24x1xf32>
    %141 = vector.broadcast %140 : vector<24x1xf32> to vector<24x4xf32>
    %142 = arith.divf %138, %141 : vector<24x4xf32>
    %cst_57 = arith.constant 0.000000e+00 : f32
    %143 = vector.broadcast %cst_57 : f32 to vector<24x59xf32>
    %144 = tpu.concatenate %125, %142, %133, %143 in 1 : vector<24x64xf32>, vector<24x4xf32>, vector<24x1xf32>, vector<24x59xf32> -> vector<24x128xf32>
    %145 = vector.shape_cast %144 : vector<24x128xf32> to vector<3x8x128xf32>
    %c0_58 = arith.constant 0 : index
    %c0_59 = arith.constant 0 : index
    %c0_60 = arith.constant 0 : index
    %146 = vector.load %arg13[%c0_58, %c0_59, %c0_60] : memref<3x8x128xf32, #tpu.memory_space<vmem>>, vector<3x8x128xf32>
    tpu.vector_store %arg13[%c0_58, %c0_59, %c0_60], %145 {strides = array<i32>} : memref<3x8x128xf32, #tpu.memory_space<vmem>>, vector<3x8x128xf32>,
    return
  }
  func.func @transform_0(%arg0: i32) -> (i32, i32, i32) {
    %c0_i32 = arith.constant 0 : i32
    %c0_i32_0 = arith.constant 0 : i32
    %c0_i32_1 = arith.constant 0 : i32
    return %c0_i32, %arg0, %c0_i32_0 : i32, i32, i32
  }
  func.func @transform_1(%arg0: i32) -> (i32, i32, i32) {
    %c0_i32 = arith.constant 0 : i32
    %c0_i32_0 = arith.constant 0 : i32
    %c0_i32_1 = arith.constant 0 : i32
    return %c0_i32, %arg0, %c0_i32_0 : i32, i32, i32
  }
  func.func @transform_2(%arg0: i32) -> (i32, i32) {
    %c0_i32 = arith.constant 0 : i32
    %c0_i32_0 = arith.constant 0 : i32
    return %arg0, %c0_i32 : i32, i32
  }
  func.func @transform_3(%arg0: i32) -> (i32, i32) {
    %c0_i32 = arith.constant 0 : i32
    %c0_i32_0 = arith.constant 0 : i32
    return %arg0, %c0_i32 : i32, i32
  }
  func.func @transform_4(%arg0: i32) -> (i32, i32) {
    %c0_i32 = arith.constant 0 : i32
    %c0_i32_0 = arith.constant 0 : i32
    %c0_i32_1 = arith.constant 0 : i32
    return %c0_i32, %c0_i32_0 : i32, i32
  }
  func.func @transform_5(%arg0: i32) -> (i32, i32) {
    %c0_i32 = arith.constant 0 : i32
    %c0_i32_0 = arith.constant 0 : i32
    %c0_i32_1 = arith.constant 0 : i32
    return %c0_i32, %c0_i32_0 : i32, i32
  }
  func.func @transform_6(%arg0: i32) -> (i32, i32) {
    %c0_i32 = arith.constant 0 : i32
    %c0_i32_0 = arith.constant 0 : i32
    %c0_i32_1 = arith.constant 0 : i32
    return %c0_i32, %c0_i32_0 : i32, i32
  }
  func.func @transform_7(%arg0: i32) -> (i32, i32) {
    %c0_i32 = arith.constant 0 : i32
    %c0_i32_0 = arith.constant 0 : i32
    %c0_i32_1 = arith.constant 0 : i32
    return %c0_i32, %c0_i32_0 : i32, i32
  }
  func.func @transform_8(%arg0: i32) -> (i32, i32) {
    %c0_i32 = arith.constant 0 : i32
    %c0_i32_0 = arith.constant 0 : i32
    %c0_i32_1 = arith.constant 0 : i32
    return %c0_i32, %c0_i32_0 : i32, i32
  }
  func.func @transform_9(%arg0: i32) -> (i32, i32) {
    %c0_i32 = arith.constant 0 : i32
    %c0_i32_0 = arith.constant 0 : i32
    %c0_i32_1 = arith.constant 0 : i32
    return %c0_i32, %c0_i32_0 : i32, i32
  }
  func.func @transform_10(%arg0: i32) -> (i32, i32) {
    %c0_i32 = arith.constant 0 : i32
    %c0_i32_0 = arith.constant 0 : i32
    %c0_i32_1 = arith.constant 0 : i32
    return %c0_i32, %c0_i32_0 : i32, i32
  }
  func.func @transform_11(%arg0: i32) -> (i32, i32) {
    %c0_i32 = arith.constant 0 : i32
    %c0_i32_0 = arith.constant 0 : i32
    %c0_i32_1 = arith.constant 0 : i32
    return %c0_i32, %c0_i32_0 : i32, i32
  }
  func.func @transform_12(%arg0: i32) -> (i32, i32, i32) {
    %c0_i32 = arith.constant 0 : i32
    %c0_i32_0 = arith.constant 0 : i32
    %c0_i32_1 = arith.constant 0 : i32
    return %c0_i32, %arg0, %c0_i32_0 : i32, i32, i32
  }
  func.func @transform_13(%arg0: i32) -> (i32, i32) {
    %c0_i32 = arith.constant 0 : i32
    %c0_i32_0 = arith.constant 0 : i32
    return %arg0, %c0_i32 : i32, i32
  }
}

</mosaic_0001>

<bundles_post_ra>
// kernel: _fused_forward.1
= control target key start
LH: loop header
LB: loop body
LE: loop exit
PB: predicated region body
PF: predicated region fallthrough
CT: control target
= control target key end

     0   :  { %vm832_vm0 = vcmask 523264   ;;  %vm1192_vm1 = vcmask 64512   ;;  %vm1465_vm2 = vcmask 261120   ;;  %vm2044_vm3 = vcmask 31744   ;;  %s3503_s4 = inlined_call_operand.vmem [shape: bf16[576,288], index: 4, kind: input, shape index: {}]   ;;  %s3504_s0 = inlined_call_operand.vmem [shape: bf16[3,8,576], index: 0, kind: input, shape index: {}]   ;;  %s3505_s6 = inlined_call_operand.vmem [shape: bf16[288,256], index: 6, kind: input, shape index: {}]   ;;  %s3506_s7 = inlined_call_operand.vmem [shape: f32[8,256], index: 7, kind: input, shape index: {}]   ;;  %s3507_s1 = inlined_call_operand.vmem [shape: f32[3,8,8], index: 1, kind: input, shape index: {}]   ;;  %s3508_s9 = inlined_call_operand.vmem [shape: f32[64,256], index: 9, kind: input, shape index: {}]   ;;  %s3509_s3 = inlined_call_operand.vmem [shape: f32[8,64], index: 3, kind: input, shape index: {}]   ;;  %s3510_s5 = inlined_call_operand.vmem [shape: f32[1,288], index: 5, kind: input, shape index: {}]   ;;  %s3511_s2 = inlined_call_operand.vmem [shape: f32[8,64], index: 2, kind: input, shape index: {}]   ;;  %s3512_s8 = inlined_call_operand.vmem [shape: f32[1,256], index: 8, kind: input, shape index: {}]   ;;  %s3513_s10 = inlined_call_operand.vmem [shape: bf16[64,5], index: 10, kind: input, shape index: {}]   ;;  %s3514_s13 = inlined_call_operand.vmem [shape: f32[8,128], index: 13, kind: output, shape index: {1}]   ;;  %s3515_s11 = inlined_call_operand.vmem [shape: f32[1,5], index: 11, kind: input, shape index: {}]   ;;  %s3516_s12 = inlined_call_operand.vmem [shape: f32[3,8,128], index: 12, kind: output, shape index: {0}]  }
   0x1   :  { %v2400_v0 = vld [vmem:[%s3503_s4 + $0xac] ss:$12 sps:$4 sm:$0xff]   ;;  %v2404_v2 = vld [vmem:[%s3503_s4 + $0xa8] ss:$12 sps:$4 sm:$0xff]   ;;  %v2410_v6 = vld [vmem:[%s3503_s4 + $0x90] ss:$12 sps:$4 sm:$0xff]  }
   0x2   :  { %v2402_v1 = vld [vmem:[%s3503_s4 + $0x22c] ss:$12 sps:$4 sm:$0xff]   ;;  %839 = vmatprep.subr.bf16.mxu0 %v2400_v0  ;;  %v2405_v3 = vld [vmem:[%s3503_s4 + $0x228] ss:$12 sps:$4 sm:$0xff]   ;;  %v2411_v7 = vld [vmem:[%s3503_s4 + $0x210] ss:$12 sps:$4 sm:$0xff]  }
   0x3   :  { %890 = vmatprep.subr.bf16.mxu1 %v2402_v1  ;;  %v2406_v4 = vld [vmem:[%s3503_s4 + $0x94] ss:$12 sps:$4 sm:$0xff]   ;;  %840 = vmatpush1.bf16.msra.mxu0 %v2404_v2  ;;  %v2412_v8 = vld [vmem:[%s3503_s4 + $0x7c] ss:$12 sps:$4 sm:$0xff]   ;;  %v2416_v10 = vld [vmem:[%s3503_s4 + $0x78] ss:$12 sps:$4 sm:$0xff]  }
   0x4   :  { %891 = vmatpush1.bf16.msra.mxu1 %v2405_v3  ;;  %v2408_v5 = vld [vmem:[%s3503_s4 + $0x214] ss:$12 sps:$4 sm:$0xff]   ;;  %841 = vmatprep.subr.bf16.mxu0 %v2406_v4  ;;  %v2414_v9 = vld [vmem:[%s3503_s4 + $0x1fc] ss:$12 sps:$4 sm:$0xff]   ;;  %v2417_v11 = vld [vmem:[%s3503_s4 + $0x1f8] ss:$12 sps:$4 sm:$0xff]  }
   0x5   :  { %892 = vmatprep.subr.bf16.mxu1 %v2408_v5  ;;  %v2418_v12 = vld [vmem:[%s3503_s4 + $0x64] ss:$12 sps:$4 sm:$0xff]   ;;  %v2422_v14 = vld [vmem:[%s3503_s4 + $0x60] ss:$12 sps:$4 sm:$0xff]   ;;  %v2428_v18 = vld [vmem:[%s3503_s4 + $0x48] ss:$12 sps:$4 sm:$0xff]  }
   0x6   :  { %v2420_v13 = vld [vmem:[%s3503_s4 + $0x1e4] ss:$12 sps:$4 sm:$0xff]   ;;  %v2423_v15 = vld [vmem:[%s3503_s4 + $0x1e0] ss:$12 sps:$4 sm:$0xff]   ;;  %v2429_v19 = vld [vmem:[%s3503_s4 + $0x1c8] ss:$12 sps:$4 sm:$0xff]  }
   0x7   :  { %842 = vmatpush1.bf16.msra.mxu0 %v2410_v6  ;;  %v2424_v16 = vld [vmem:[%s3503_s4 + $0x4c] ss:$12 sps:$4 sm:$0xff]   ;;  %v2430_v20 = vld [vmem:[%s3503_s4 + $0x34] ss:$12 sps:$4 sm:$0xff]   ;;  %v2434_v22 = vld [vmem:[%s3503_s4 + $0x30] ss:$12 sps:$4 sm:$0xff]  }
   0x8   :  { %893 = vmatpush1.bf16.msra.mxu1 %v2411_v7  ;;  %843 = vmatprep.subr.bf16.mxu0 %v2412_v8  ;;  %v2426_v17 = vld [vmem:[%s3503_s4 + $0x1cc] ss:$12 sps:$4 sm:$0xff]   ;;  %v2432_v21 = vld [vmem:[%s3503_s4 + $0x1b4] ss:$12 sps:$4 sm:$0xff]   ;;  %v2435_v23 = vld [vmem:[%s3503_s4 + $0x1b0] ss:$12 sps:$4 sm:$0xff]  }
   0x9   :  { %894 = vmatprep.subr.bf16.mxu1 %v2414_v9  ;;  %v2436_v24 = vld [vmem:[%s3503_s4 + $0x1c] ss:$12 sps:$4 sm:$0xff]   ;;  %v2440_v26 = vld [vmem:[%s3503_s4 + $0x18] ss:$12 sps:$4 sm:$0xff]   ;;  %v2446_v30 = vld [vmem:[%s3503_s4] ss:$12 sps:$4 sm:$0xff]  }
   0xa   :  { %v2438_v25 = vld [vmem:[%s3503_s4 + $0x19c] ss:$12 sps:$4 sm:$0xff]   ;;  %v2441_v27 = vld [vmem:[%s3503_s4 + $0x198] ss:$12 sps:$4 sm:$0xff]   ;;  %v2447_v31 = vld [vmem:[%s3503_s4 + $0x180] ss:$12 sps:$4 sm:$0xff]  }
   0xb   :  { %844 = vmatpush1.bf16.msra.mxu0 %v2416_v10  ;;  %v2442_v28 = vld [vmem:[%s3503_s4 + $0x4] ss:$12 sps:$4 sm:$0xff]   ;;  %v2448_v32 = vld [vmem:[%s3503_s4 + $0x16c] ss:$12 sps:$4 sm:$0xff]   ;;  %v2452_v34 = vld [vmem:[%s3503_s4 + $0x168] ss:$12 sps:$4 sm:$0xff]  }
   0xc   :  { %895 = vmatpush1.bf16.msra.mxu1 %v2417_v11  ;;  %845 = vmatprep.subr.bf16.mxu0 %v2418_v12  ;;  %v2444_v29 = vld [vmem:[%s3503_s4 + $0x184] ss:$12 sps:$4 sm:$0xff]   ;;  %v2450_v33 = vld [vmem:[%s3503_s4 + $0x2ec] ss:$12 sps:$4 sm:$0xff]   ;;  %v2453_v35 = vld [vmem:[%s3503_s4 + $0x2e8] ss:$12 sps:$4 sm:$0xff]  }
   0xd   :  { %896 = vmatprep.subr.bf16.mxu1 %v2420_v13  ;;  %v2454_v36 = vld [vmem:[%s3503_s4 + $0x154] ss:$12 sps:$4 sm:$0xff]   ;;  %v2458_v38 = vld [vmem:[%s3503_s4 + $0x150] ss:$12 sps:$4 sm:$0xff]   ;;  %v2464_v42 = vld [vmem:[%s3503_s4 + $0x138] ss:$12 sps:$4 sm:$0xff]  }
   0xe   :  { %v2456_v37 = vld [vmem:[%s3503_s4 + $0x2d4] ss:$12 sps:$4 sm:$0xff]   ;;  %v2459_v39 = vld [vmem:[%s3503_s4 + $0x2d0] ss:$12 sps:$4 sm:$0xff]   ;;  %v2465_v43 = vld [vmem:[%s3503_s4 + $0x2b8] ss:$12 sps:$4 sm:$0xff]  }
   0xf   :  { %846 = vmatpush1.bf16.msra.mxu0 %v2422_v14  ;;  %v2460_v40 = vld [vmem:[%s3503_s4 + $0x13c] ss:$12 sps:$4 sm:$0xff]   ;;  %v2466_v44 = vld [vmem:[%s3503_s4 + $0x124] ss:$12 sps:$4 sm:$0xff]   ;;  %v2470_v46 = vld [vmem:[%s3503_s4 + $0x120] ss:$12 sps:$4 sm:$0xff]  }
  0x10   :  { %897 = vmatpush1.bf16.msra.mxu1 %v2423_v15  ;;  %847 = vmatprep.subr.bf16.mxu0 %v2424_v16  ;;  %v2462_v41 = vld [vmem:[%s3503_s4 + $0x2bc] ss:$12 sps:$4 sm:$0xff]   ;;  %v2468_v45 = vld [vmem:[%s3503_s4 + $0x2a4] ss:$12 sps:$4 sm:$0xff]   ;;  %v2471_v47 = vld [vmem:[%s3503_s4 + $0x2a0] ss:$12 sps:$4 sm:$0xff]  }
  0x11   :  { %898 = vmatprep.subr.bf16.mxu1 %v2426_v17  ;;  %v2472_v48 = vld [vmem:[%s3503_s4 + $0x10c] ss:$12 sps:$4 sm:$0xff]   ;;  %v2476_v52 = vld [vmem:[%s3503_s4 + $0x108] ss:$12 sps:$4 sm:$0xff]   ;;  %v2482_v56 = vld [vmem:[%s3503_s4 + $0xf0] ss:$12 sps:$4 sm:$0xff]  }
  0x12   :  { %v2885_v49 = vld [vmem:[%s3504_s0 + $0x4] ss:$20 sps:$4 sm:$0xff]   ;;  %v2893_v51 = vld [vmem:[%s3504_s0 + $0xc] ss:$20 sps:$4 sm:$0xff]   ;;  %v2477_v53 = vld [vmem:[%s3503_s4 + $0x288] ss:$12 sps:$4 sm:$0xff]  }
  0x13   :  { %848 = vmatpush1.bf16.msra.mxu0 %v2428_v18  ;;  %v2474_v50 = vld [vmem:[%s3503_s4 + $0x28c] ss:$12 sps:$4 sm:$0xff]   ;;  %871 = vmatprep.mubr.bf16.mxu0 %v2885_v49  ;;  %v2478_v54 = vld [vmem:[%s3503_s4 + $0xf4] ss:$12 sps:$4 sm:$0xff]   ;;  %v2483_v57 = vld [vmem:[%s3503_s4 + $0x270] ss:$12 sps:$4 sm:$0xff]  }
  0x14   :  { %899 = vmatpush1.bf16.msra.mxu1 %v2429_v19  ;;  %849 = vmatprep.subr.bf16.mxu0 %v2430_v20  ;;  %v2480_v55 = vld [vmem:[%s3503_s4 + $0x274] ss:$12 sps:$4 sm:$0xff]   ;;  %v2484_v58 = vld [vmem:[%s3503_s4 + $0xdc] ss:$12 sps:$4 sm:$0xff]   ;;  %v2488_v60 = vld [vmem:[%s3503_s4 + $0xd8] ss:$12 sps:$4 sm:$0xff]  }
  0x15   :  { %900 = vmatprep.subr.bf16.mxu1 %v2432_v21  ;;  %922 = vmatprep.mubr.bf16.mxu1 %v2893_v51  ;;  %v2486_v59 = vld [vmem:[%s3503_s4 + $0x25c] ss:$12 sps:$4 sm:$0xff]   ;;  %v2489_v61 = vld [vmem:[%s3503_s4 + $0x258] ss:$12 sps:$4 sm:$0xff]   ;;  %v2494_v0 = vld [vmem:[%s3503_s4 + $0xc0] ss:$12 sps:$4 sm:$0xff]  }
  0x16   :  { %v2490_v62 = vld [vmem:[%s3503_s4 + $0xc4] ss:$12 sps:$4 sm:$0xff]   ;;  %v2495_v1 = vld [vmem:[%s3503_s4 + $0x240] ss:$12 sps:$4 sm:$0xff]   ;;  %v2950_v4 = vld [vmem:[%s3504_s0 + $0x8] ss:$20 sps:$4 sm:$0xff]  }
  0x17   :  { %850 = vmatpush1.bf16.msra.mxu0 %v2434_v22  ;;  %v2492_v63 = vld [vmem:[%s3503_s4 + $0x244] ss:$12 sps:$4 sm:$0xff]   ;;  %v2504_v2 = vld [vmem:[%s3503_s4 + $0x34c] ss:$12 sps:$4 sm:$0xff]   ;;  %v2945_v3 = vld [vmem:[%s3504_s0] ss:$20 sps:$4 sm:$0xff]  }
  0x18   :  { %901 = vmatpush1.bf16.msra.mxu1 %v2435_v23  ;;  %851 = vmatprep.subr.bf16.mxu0 %v2436_v24  ;;  %v2505_v5 = vld [vmem:[%s3503_s4 + $0x170] ss:$12 sps:$4 sm:$0xff]   ;;  %v2502_v6 = vld [vmem:[%s3503_s4 + $0x348] ss:$12 sps:$4 sm:$0xff]   ;;  %v2510_v11 = vld [vmem:[%s3503_s4 + $0x158] ss:$12 sps:$4 sm:$0xff]  }
  0x19   :  { %902 = vmatprep.subr.bf16.mxu1 %v2438_v25  ;;  %v2506_v7 = vld [vmem:[%s3503_s4 + $0xb0] ss:$12 sps:$4 sm:$0xff]   ;;  %v50_v8 = vld [vmem:[%s3504_s0 + $0x28] sm:$0xff]  ;;  %v2509_v10 = vld [vmem:[%s3503_s4 + $0x334] ss:$12 sps:$4 sm:$0xff]   ;;  %vm2105_vm4 = vcmask 556032  }
  0x1a   :  { %v51_v9 = vld [vmem:[%s3504_s0 + $0x30] sm:$0xff]  ;;  %v2973_v12 = vcombine.high %v50_v8, %v50_v8  ;;  %v2511_v15 = vld [vmem:[%s3503_s4 + $0x98] ss:$12 sps:$4 sm:$0xff]   ;;  %v2516_v16 = vld [vmem:[%s3503_s4 + $0x31c] ss:$12 sps:$4 sm:$0xff]   ;;  %v2996_v19 = vcombine.low %v50_v8, %v50_v8  ;;  %vm2109_vm5 = vcmask 564224  }
  0x1b   :  { %852 = vmatpush1.bf16.msra.mxu0 %v2440_v26  ;;  %v2975_v13 = vcombine.high %v51_v9, %v51_v9  ;;  %v2507_v14 = vld [vmem:[%s3503_s4 + $0x330] ss:$12 sps:$4 sm:$0xff]   ;;  %v2517_v17 = vld [vmem:[%s3503_s4 + $0x140] ss:$12 sps:$4 sm:$0xff]   ;;  %v2514_v18 = vld [vmem:[%s3503_s4 + $0x318] ss:$12 sps:$4 sm:$0xff]   ;;  %v3001_v21 = vcombine.low %v51_v9, %v51_v9 }
  0x1c   :  { %903 = vmatpush1.bf16.msra.mxu1 %v2441_v27  ;;  %853 = vmatprep.subr.bf16.mxu0 %v2442_v28  ;;  %v2519_v20 = vld [vmem:[%s3503_s4 + $0x80] ss:$12 sps:$4 sm:$0xff]   ;;  %v2523_v22 = vld [vmem:[%s3503_s4 + $0x304] ss:$12 sps:$4 sm:$0xff]   ;;  %v2524_v23 = vld [vmem:[%s3503_s4 + $0x128] ss:$12 sps:$4 sm:$0xff]  }
  0x1d   :  { %904 = vmatprep.subr.bf16.mxu1 %v2444_v29  ;;  %v2521_v24 = vld [vmem:[%s3503_s4 + $0x300] ss:$12 sps:$4 sm:$0xff]   ;;  %v2525_v25 = vld [vmem:[%s3503_s4 + $0x68] ss:$12 sps:$4 sm:$0xff]   ;;  %v2527_v26 = vld [vmem:[%s3503_s4 + $0x110] ss:$12 sps:$4 sm:$0xff]  }
  0x1e   :  { %v3023_v27 = vld [vmem:[%s3504_s0 + $0x10] ss:$20 sps:$4 sm:$0xff]   ;;  %v2662_v29 = vmov 0   ;;  %v2577_v8 = vld [vmem:[%s3505_s6] ss:$8 sps:$4 sm:$0xff]  }
  0x1f   :  { %854 = vmatpush1.bf16.msra.mxu0 %v2446_v30  ;;  %v2528_v28 = vld [vmem:[%s3503_s4 + $0x2f0] ss:$12 sps:$4 sm:$0xff]  }
  0x20   :  { %905 = vmatpush1.bf16.msra.mxu1 %v2447_v31  ;;  %855 = vmatprep.subr.bf16.mxu0 %v2448_v32  ;;  %v2529_v30 = vld [vmem:[%s3503_s4 + $0x50] ss:$12 sps:$4 sm:$0xff]   ;;  %v2531_v32 = vld [vmem:[%s3503_s4 + $0xf8] ss:$12 sps:$4 sm:$0xff]  }
  0x21   :  { %906 = vmatprep.subr.bf16.mxu1 %v2450_v33  ;;  %v2530_v31 = vld [vmem:[%s3503_s4 + $0x230] ss:$12 sps:$4 sm:$0xff]   ;;  %v2532_v33 = vld [vmem:[%s3503_s4 + $0x2d8] ss:$12 sps:$4 sm:$0xff]  }
  0x22   :  { %v2582_v9 = vld [vmem:[%s3505_s6 + $0xf4] ss:$8 sps:$4 sm:$0xff]  }
  0x23   :  { %856 = vmatpush2.bf16.msra.mxu0 %v2452_v34  ;;  %v2533_v34 = vld [vmem:[%s3503_s4 + $0x38] ss:$12 sps:$4 sm:$0xff]  }
  0x24   :  { %907 = vmatpush2.bf16.msra.mxu1 %v2453_v35  ;;  %857 = vmatprep.subr.bf16.mxu0 %v2454_v36  ;;  %v2534_v35 = vld [vmem:[%s3503_s4 + $0x218] ss:$12 sps:$4 sm:$0xff]   ;;  %v2536_v36 = vld [vmem:[%s3503_s4 + $0xe0] ss:$12 sps:$4 sm:$0xff]  }
  0x25   :  { %908 = vmatprep.subr.bf16.mxu1 %v2456_v37  ;;  %v2535_v37 = vld [vmem:[%s3504_s0 + $0x38] ss:$0 sps:$4 sm:$0xff]   ;;  %s2664_s0 = smov 64  }
  0x27   :  { %858 = vmatpush2.bf16.msra.mxu0 %v2458_v38  ;;  %v2537_v38 = vld [vmem:[%s3503_s4 + $0x2c0] ss:$12 sps:$4 sm:$0xff]  }
  0x28   :  { %909 = vmatpush2.bf16.msra.mxu1 %v2459_v39  ;;  %859 = vmatprep.subr.bf16.mxu0 %v2460_v40  ;;  %v2538_v39 = vld [vmem:[%s3503_s4 + $0x20] ss:$12 sps:$4 sm:$0xff]  }
  0x29   :  { %910 = vmatprep.subr.bf16.mxu1 %v2462_v41  ;;  %v2539_v40 = vld [vmem:[%s3503_s4 + $0x200] ss:$12 sps:$4 sm:$0xff]   ;;  %v2540_v41 = vld [vmem:[%s3503_s4 + $0xc8] ss:$12 sps:$4 sm:$0xff]  }
  0x2b   :  { %860 = vmatpush2.bf16.msra.mxu0 %v2464_v42  ;;  %v2541_v42 = vld [vmem:[%s3503_s4 + $0x2a8] ss:$12 sps:$4 sm:$0xff]  }
  0x2c   :  { %911 = vmatpush2.bf16.msra.mxu1 %v2465_v43  ;;  %861 = vmatprep.subr.bf16.mxu0 %v2466_v44  ;;  %v2542_v43 = vld [vmem:[%s3503_s4 + $0x8] ss:$12 sps:$4 sm:$0xff]  }
  0x2d   :  { %912 = vmatprep.subr.bf16.mxu1 %v2468_v45  ;;  %v2543_v44 = vld [vmem:[%s3503_s4 + $0x1e8] ss:$12 sps:$4 sm:$0xff]   ;;  %v2544_v45 = vld [vmem:[%s3503_s4 + $0x290] ss:$12 sps:$4 sm:$0xff]  }
  0x2f   :  { %862 = vmatpush2.bf16.msra.mxu0 %v2470_v46  ;;  %v2545_v46 = vld [vmem:[%s3503_s4 + $0x350] ss:$12 sps:$4 sm:$0xff]  }
  0x30   :  { %913 = vmatpush2.bf16.msra.mxu1 %v2471_v47  ;;  %863 = vmatprep.subr.bf16.mxu0 %v2472_v48  ;;  %v2546_v47 = vld [vmem:[%s3503_s4 + $0x1d0] ss:$12 sps:$4 sm:$0xff]   ;;  %v2547_v48 = vld [vmem:[%s3503_s4 + $0x278] ss:$12 sps:$4 sm:$0xff]  }
  0x31   :  { %914 = vmatprep.subr.bf16.mxu1 %v2474_v50  ;;  %v2549_v50 = vld [vmem:[%s3503_s4 + $0x1b8] ss:$12 sps:$4 sm:$0xff]  }
  0x33   :  { %864 = vmatpush2.bf16.msra.mxu0 %v2476_v52  ;;  %v2551_v52 = vld [vmem:[%s3503_s4 + $0x320] ss:$12 sps:$4 sm:$0xff]  }
  0x34   :  { %915 = vmatpush2.bf16.msra.mxu1 %v2477_v53  ;;  %865 = vmatprep.subr.bf16.mxu0 %v2478_v54  ;;  %v2552_v53 = vld [vmem:[%s3503_s4 + $0x1a0] ss:$12 sps:$4 sm:$0xff]   ;;  %v2553_v54 = vld [vmem:[%s3503_s4 + $0x248] ss:$12 sps:$4 sm:$0xff]  }
  0x35   :  { %916 = vmatprep.subr.bf16.mxu1 %v2480_v55  ;;  %v2554_v55 = vld [vmem:[%s3503_s4 + $0x308] ss:$12 sps:$4 sm:$0xff]  }
  0x37   :  { %866 = vmatpush2.bf16.msra.mxu0 %v2482_v56  ;;  %v2555_v56 = vld [vmem:[%s3503_s4 + $0x188] ss:$12 sps:$4 sm:$0xff]  }
  0x38   :  { %917 = vmatpush2.bf16.msra.mxu1 %v2483_v57  ;;  %867 = vmatprep.subr.bf16.mxu0 %v2484_v58  ;;  %v2558_v57 = vld [vmem:[%s3505_s6 + $0x74] ss:$8 sps:$4 sm:$0xff]   ;;  %v2556_v58 = vld [vmem:[%s3505_s6 + $0x70] ss:$8 sps:$4 sm:$0xff]  }
  0x39   :  { %918 = vmatprep.subr.bf16.mxu1 %v2486_v59  ;;  %v2561_v59 = vld [vmem:[%s3505_s6 + $0x64] ss:$8 sps:$4 sm:$0xff]  }
  0x3b   :  { %868 = vmatpush2.bf16.msra.mxu0 %v2488_v60  ;;  %v2559_v60 = vld [vmem:[%s3505_s6 + $0x60] ss:$8 sps:$4 sm:$0xff]  }
  0x3c   :  { %919 = vmatpush2.bf16.msra.mxu1 %v2489_v61  ;;  %869 = vmatprep.subr.bf16.mxu0 %v2490_v62  ;;  %v2564_v61 = vld [vmem:[%s3505_s6 + $0x54] ss:$8 sps:$4 sm:$0xff]   ;;  %v2562_v62 = vld [vmem:[%s3505_s6 + $0x50] ss:$8 sps:$4 sm:$0xff]  }
  0x3d   :  { %920 = vmatprep.subr.bf16.mxu1 %v2492_v63  ;;  %v2567_v63 = vld [vmem:[%s3505_s6 + $0x44] ss:$8 sps:$4 sm:$0xff]  }
  0x3f   :  { %870 = vmatpush2.bf16.msra.mxu0 %v2494_v0  ;;  %v2565_v0 = vld [vmem:[%s3505_s6 + $0x40] ss:$8 sps:$4 sm:$0xff]  }
  0x40   :  { %921 = vmatpush2.bf16.msra.mxu1 %v2495_v1  ;;  %949 = vmatprep.subr.bf16.mxu0 %v2504_v2  ;;  %v2570_v1 = vld [vmem:[%s3505_s6 + $0x34] ss:$8 sps:$4 sm:$0xff]   ;;  %v2568_v2 = vld [vmem:[%s3505_s6 + $0x30] ss:$8 sps:$4 sm:$0xff]  }
  0x41   :  { %2305 = vmatprep.subr.bf16.mxu1 %v2505_v5  ;;  %v2576_v5 = vld [vmem:[%s3505_s6 + $0x14] ss:$8 sps:$4 sm:$0xff]  }
  0x42   :  { %872 = vmatmul.mubr.bf16.vlgmr.msra.gmra.mxu0 %v2945_v3 }
  0x43   :  { %923 = vmatmul.mubr.bf16.vlgmr.msra.gmra.mxu1 %v2950_v4  ;;  %950 = vmatpush1.bf16.msra.mxu0 %v2502_v6  ;;  %v2574_v6 = vld [vmem:[%s3505_s6 + $0x10] ss:$8 sps:$4 sm:$0xff]  }
  0x44   :  { %2306 = vmatpush3.bf16.msra.mxu1 %v2506_v7  ;;  %951 = vmatprep.subr.bf16.mxu0 %v2509_v10  ;;  %v2579_v7 = vld [vmem:[%s3505_s6 + $0x4] ss:$8 sps:$4 sm:$0xff]   ;;  %v2580_v10 = vld [vmem:[%s3505_s6 + $0xf0] ss:$8 sps:$4 sm:$0xff]  }
  0x45   :  { %2307 = vmatprep.subr.bf16.mxu1 %v2510_v11  ;;  %881 = vmatprep.mubr.bf16.mxu0 %v2973_v12  ;;  %v2585_v11 = vld [vmem:[%s3505_s6 + $0xe4] ss:$8 sps:$4 sm:$0xff]  }
  0x46   :  { %932 = vmatprep.mubr.bf16.mxu1 %v2975_v13 }
  0x47   :  { %952 = vmatpush1.bf16.msra.mxu0 %v2507_v14  ;;  %v2586_v14 = vld [vmem:[%s3505_s6 + $0xd0] ss:$8 sps:$4 sm:$0xff]  }
  0x48   :  { %2308 = vmatpush3.bf16.msra.mxu1 %v2511_v15  ;;  %953 = vmatprep.subr.bf16.mxu0 %v2516_v16  ;;  %v2591_v15 = vld [vmem:[%s3505_s6 + $0xc4] ss:$8 sps:$4 sm:$0xff]   ;;  %v2589_v16 = vld [vmem:[%s3505_s6 + $0xc0] ss:$8 sps:$4 sm:$0xff]  }
  0x49   :  { %2309 = vmatprep.subr.bf16.mxu1 %v2517_v17  ;;  %v2594_v17 = vld [vmem:[%s3505_s6 + $0xb4] ss:$8 sps:$4 sm:$0xff]  }
  0x4a   :  { %882 = vmatmul.mubr.bf16.gmra.mxu0 %v2996_v19 }
  0x4b   :  { %933 = vmatmul.mubr.bf16.gmra.mxu1 %v3001_v21  ;;  %954 = vmatpush1.bf16.msra.mxu0 %v2514_v18  ;;  %v1191_v18 = vld [vmem:[%s3506_s7 + $0x8] sm:$0xff] }
  0x4c   :  { %2310 = vmatpush3.bf16.msra.mxu1 %v2519_v20  ;;  %955 = vmatprep.subr.bf16.mxu0 %v2523_v22  ;;  %v2592_v20 = vld [vmem:[%s3505_s6 + $0xb0] ss:$8 sps:$4 sm:$0xff]   ;;  %v2597_v22 = vld [vmem:[%s3505_s6 + $0xa4] ss:$8 sps:$4 sm:$0xff]  }
  0x4d   :  { %2311 = vmatprep.subr.bf16.mxu1 %v2524_v23  ;;  %973 = vmatprep.mubr.bf16.mxu0 %v2662_v29  ;;  %v2663_v23 = vmov 0.0  }
  0x4e   :  { %1024 = vmatprep.mubr.bf16.mxu1 %v2885_v49  ;;  %v2548_v49 = vld [vmem:[%s3503_s4 + $0x338] ss:$12 sps:$4 sm:$0xff]  }
  0x4f   :  { %956 = vmatpush1.bf16.msra.mxu0 %v2521_v24  ;;  %v2595_v24 = vld [vmem:[%s3505_s6 + $0xa0] ss:$8 sps:$4 sm:$0xff]  }
  0x50   :  { %2312 = vmatpush3.bf16.msra.mxu1 %v2525_v25  ;;  %2333 = vmatprep.subr.bf16.mxu0 %v2528_v28  ;;  %v1146_v25 = vld [vmem:[%s3507_s1 + $0x8] sm:$0xff]  ;;  %v1147_v28 = vld [vmem:[%s3507_s1 + $0x10] sm:$0xff] }
  0x51   :  { %2313 = vmatprep.subr.bf16.mxu1 %v2527_v26  ;;  %v2600_v26 = vld [vmem:[%s3505_s6 + $0x94] ss:$8 sps:$4 sm:$0xff]  }
  0x52   :  { %2244 = vmatmul.mubr.msk.bf16.vlgmr.msra.gmra.mxu0 %vm832_vm0, %v3023_v27 }
  0x53   :  { %2334 = vmatpush3.bf16.msra.mxu0 %v2530_v31  ;;  %983 = vmatprep.mubr.bf16.mxu0 %v2662_v29  ;;  %v2601_v31 = vld [vmem:[%s3505_s6 + $0x80] ss:$8 sps:$4 sm:$0xff]  }
  0x54   :  { %2314 = vmatpush3.bf16.msra.mxu1 %v2529_v30  ;;  %2335 = vmatprep.subr.bf16.mxu0 %v2532_v33  ;;  %v2603_v30 = vld [vmem:[%s3505_s6 + $0x84] ss:$8 sps:$4 sm:$0xff]   ;;  %v2604_v33 = vld [vmem:[%s3505_s6 + $0x110] ss:$8 sps:$4 sm:$0xff]  }
  0x55   :  { %2315 = vmatprep.subr.bf16.mxu1 %v2531_v32  ;;  %v2606_v32 = vld [vmem:[%s3505_s6 + $0x114] ss:$8 sps:$4 sm:$0xff]  }
  0x57   :  { %2336 = vmatpush3.bf16.msra.mxu0 %v2534_v35  ;;  %v2607_v35 = vld [vmem:[%s3505_s6 + $0x100] ss:$8 sps:$4 sm:$0xff]  }
  0x58   :  { %2316 = vmatpush3.bf16.msra.mxu1 %v2533_v34  ;;  %2337 = vmatprep.subr.bf16.mxu0 %v2537_v38  ;;  %v2609_v34 = vld [vmem:[%s3505_s6 + $0x104] ss:$8 sps:$4 sm:$0xff]   ;;  %v199_v38 = vlaneseq }
  0x59   :  { %2317 = vmatprep.subr.bf16.mxu1 %v2536_v36  ;;  %v3258_v36 = vld [vmem:[%s3508_s9 + $0x78] sm:$0xff] }
  0x5a   :  { %2245 = vmatmul.mubr.msk.bf16.gmra.mxu0 %vm832_vm0, %v2535_v37 }
  0x5b   :  { %2338 = vmatpush3.bf16.msra.mxu0 %v2539_v40  ;;  %1072 = vmatprep.mubr.bf16.mxu0 %v2893_v51  ;;  %v2550_v51 = vld [vmem:[%s3503_s4 + $0x260] ss:$12 sps:$4 sm:$0xff]  }
  0x5c   :  { %2318 = vmatpush3.bf16.msra.mxu1 %v2538_v39  ;;  %2339 = vmatprep.subr.bf16.mxu0 %v2541_v42 }
  0x5d   :  { %2319 = vmatprep.subr.bf16.mxu1 %v2540_v41 }
  0x5f   :  { %2340 = vmatpush3.bf16.msra.mxu0 %v2543_v44 }
  0x60   :  { %2320 = vmatpush3.bf16.msra.mxu1 %v2542_v43  ;;  %2341 = vmatprep.subr.bf16.mxu0 %v2544_v45  ;;  %v3265_v43 = vshrl.u32 %v199_v38, 7 }
  0x61   :  { %2373 = vmatprep.subr.bf16.mxu1 %v2545_v46 }
  0x63   :  { %1025 = vmatmul.mubr.bf16.vlgmr.msra.gmra.mxu1 %v2945_v3  ;;  %2342 = vmatpush3.bf16.msra.mxu0 %v2546_v47  ;;  %v2573_v3 = vld [vmem:[%s3505_s6 + $0x24] ss:$8 sps:$4 sm:$0xff]  }
  0x64   :  { %2374 = vmatpush3.bf16.msra.mxu1 %v2545_v46  ;;  %2343 = vmatprep.subr.bf16.mxu0 %v2547_v48  ;;  %v205_v48 = vsub.s32 1, %v3265_v43 }
  0x65   :  { %2375 = vmatprep.subr.bf16.mxu1 %v2548_v49  ;;  %1032 = vmatprep.mubr.bf16.mxu1 %v2973_v12  ;;  %v2583_v12 = vld [vmem:[%s3505_s6 + $0xe0] ss:$8 sps:$4 sm:$0xff]  }
  0x67   :  { %2344 = vmatpush3.bf16.msra.mxu0 %v2549_v50  ;;  %v201_v50 = vsub.s32 0, %v3265_v43 }
  0x68   :  { %2376 = vmatpush3.bf16.msra.mxu1 %v2548_v49  ;;  %2345 = vmatprep.subr.bf16.mxu0 %v2550_v51  ;;  %v197_v49 = vld [vmem:[%s3510_s5] sm:$0x7] }
  0x69   :  { %2377 = vmatprep.subr.bf16.mxu1 %v2551_v52 }
  0x6b   :  { %1033 = vmatmul.mubr.bf16.gmra.mxu1 %v2996_v19  ;;  %2346 = vmatpush3.bf16.msra.mxu0 %v2552_v53  ;;  %v1190_v19 = vld [vmem:[%s3506_s7] sm:$0xff] }
  0x6c   :  { %2378 = vmatpush3.bf16.msra.mxu1 %v2551_v52  ;;  %2347 = vmatprep.subr.bf16.mxu0 %v2553_v54 }
  0x6d   :  { %2379 = vmatprep.subr.bf16.mxu1 %v2554_v55  ;;  %2381 = vmatprep.mubr.msk.bf16.mxu1 %vm832_vm0, %v3023_v27  ;;  %v2598_v27 = vld [vmem:[%s3505_s6 + $0x90] ss:$8 sps:$4 sm:$0xff]  }
  0x6f   :  { %2348 = vmatpush3.bf16.msra.mxu0 %v2555_v56  ;;  %v202_v56 = vrot.slane %v197_v49, %v201_v50 }
  0x70   :  { %2380 = vmatpush3.bf16.msra.mxu1 %v2554_v55  ;;  %1472 = vmatprep.subr.bf16.mxu0 %v2558_v57  ;;  %v206_v55 = vrot.slane %v197_v49, %v205_v48 }
  0x71   :  { %1232 = vmatprep.subr.mxu1 %v1191_v18 }
  0x72   :  { %1073 = vmatmul.mubr.bf16.vlgmr.msra.gmra.mxu0 %v2950_v4  ;;  %v2571_v4 = vld [vmem:[%s3505_s6 + $0x20] ss:$8 sps:$4 sm:$0xff]  }
  0x73   :  { %2382 = vmatmul.mubr.msk.bf16.vlgmr.msra.gmra.mxu1 %vm832_vm0, %v2535_v37  ;;  %1080 = vmatprep.mubr.bf16.mxu0 %v2975_v13  ;;  %v2588_v13 = vld [vmem:[%s3505_s6 + $0xd4] ss:$8 sps:$4 sm:$0xff]   ;;  %v1615_v37 = vld [vmem:[%s3509_s3] sm:$0xff] }
  0x74   :  { %1473 = vmatpush1.bf16.msra.mxu0 %v2556_v58  ;;  %1233 = vmatpush1.msra.mxu1 %v1190_v19 }
  0x75   :  { %1474 = vmatprep.subr.bf16.mxu0 %v2561_v59  ;;  %1266 = vmatprep.mubr.f32.mxu1 %v2663_v23 }
  0x76   :  { %1535 = vmatprep.subr.bf16.mxu1 %v2606_v32  ;;  %1711 = vrot.lane.b32.xlu0 %v1615_v37, %s2664_s0 }
  0x78   :  { %1475 = vmatpush1.bf16.msra.mxu0 %v2559_v60 }
  0x79   :  { %1476 = vmatprep.subr.bf16.mxu0 %v2564_v61 }
  0x7a   :  { %1081 = vmatmul.mubr.bf16.gmra.mxu0 %v3001_v21  ;;  %v1145_v21 = vld [vmem:[%s3507_s1] sm:$0xff] }
  0x7b   :  { %2248 = vmatmul.mubr.msk.f32.vlgmr.msra.gmra.mxu1 %vm1192_vm1, %v1145_v21 }
  0x7c   :  { %1477 = vmatpush1.bf16.msra.mxu0 %v2562_v62  ;;  %1272 = vmatprep.mubr.f32.mxu1 %v2663_v23 }
  0x7d   :  { %1478 = vmatprep.subr.bf16.mxu0 %v2567_v63  ;;  %1536 = vmatpush1.bf16.msra.mxu1 %v2604_v33 }
  0x7e   :  { %1537 = vmatprep.subr.bf16.mxu1 %v2609_v34 }
  0x7f   :  { %2249 = vmatmul.mubr.msk.f32.gmra.mxu1 %vm1192_vm1, %v1146_v25 }
  0x80   :  { %1479 = vmatpush1.bf16.msra.mxu0 %v2565_v0  ;;  %1278 = vmatprep.mubr.f32.mxu1 %v2663_v23 }
  0x81   :  { %1480 = vmatprep.subr.bf16.mxu0 %v2570_v1  ;;  %1538 = vmatpush1.bf16.msra.mxu1 %v2607_v35 }
  0x82   :  { %1640 = vmatprep.subr.mxu1 %v3258_v36 }
  0x83   :  { %2250 = vmatmul.mubr.msk.f32.gmra.mxu1 %vm1192_vm1, %v1147_v28 }
  0x84   :  { %1481 = vmatpush1.bf16.msra.mxu0 %v2568_v2  ;;  %1555 = vmatprep.mubr.bf16.mxu1 %v2662_v29 }
  0x85   :  { %1482 = vmatprep.subr.bf16.mxu0 %v2573_v3 }
  0x88   :  { %1483 = vmatpush1.bf16.msra.mxu0 %v2571_v4 }
  0x89   :  { %1484 = vmatprep.subr.bf16.mxu0 %v2576_v5 }
  0x8c   :  { %1485 = vmatpush1.bf16.msra.mxu0 %v2574_v6 }
  0x8d   :  { %1486 = vmatprep.subr.bf16.mxu0 %v2579_v7 }
  0x90   :  { %1487 = vmatpush1.bf16.msra.mxu0 %v2577_v8 }
  0x91   :  { %1488 = vmatprep.subr.bf16.mxu0 %v2582_v9 }
  0x94   :  { %1489 = vmatpush2.bf16.msra.mxu0 %v2580_v10 }
  0x95   :  { %1490 = vmatprep.subr.bf16.mxu0 %v2585_v11 }
  0x98   :  { %1491 = vmatpush2.bf16.msra.mxu0 %v2583_v12 }
  0x99   :  { %1492 = vmatprep.subr.bf16.mxu0 %v2588_v13 }
  0x9c   :  { %1493 = vmatpush2.bf16.msra.mxu0 %v2586_v14 }
  0x9d   :  { %1494 = vmatprep.subr.bf16.mxu0 %v2591_v15 }
  0xa0   :  { %1495 = vmatpush2.bf16.msra.mxu0 %v2589_v16 }
  0xa1   :  { %1496 = vmatprep.subr.bf16.mxu0 %v2594_v17 }
  0xa4   :  { %1497 = vmatpush2.bf16.msra.mxu0 %v2592_v20 }
  0xa5   :  { %1498 = vmatprep.subr.bf16.mxu0 %v2597_v22 }
  0xa8   :  { %1499 = vmatpush2.bf16.msra.mxu0 %v2595_v24 }
  0xa9   :  { %1500 = vmatprep.subr.bf16.mxu0 %v2600_v26 }
  0xac   :  { %1501 = vmatpush2.bf16.msra.mxu0 %v2598_v27 }
  0xad   :  { %1502 = vmatprep.subr.bf16.mxu0 %v2603_v30 }
  0xb0   :  { %1503 = vmatpush2.bf16.msra.mxu0 %v2601_v31 }
 0x102   :  { %v873_v39 = vpop.f32.mrf.mxu0 }
 0x103   :  { %v924_v40 = vpop.f32.mrf.mxu1  ;;  %v874_v63 = vadd.f32 %v873_v39, %v202_v56 }
 0x104   :  { %v875_v41 = vpop.f32.mrf.mxu0 }
 0x105   :  { %v926_v42 = vpop.f32.mrf.mxu1  ;;  %v876_v61 = vadd.f32 %v875_v41, %v206_v55  ;;  %v925_v5 = vadd.f32 %v924_v40, %v874_v63 }
 0x106   :  { %v877_v44 = vpop.f32.mrf.mxu0 }
 0x107   :  { %v928_v45 = vpop.f32.mrf.mxu1  ;;  %v878_v62 = vadd.f32 %v877_v44, %v202_v56  ;;  %v927_v3 = vadd.f32 %v926_v42, %v876_v61  ;;  %v209_v42 = vsub.s32 2, %v3265_v43 }
 0x108   :  { %v879_v46 = vpop.f32.mrf.mxu0 }
 0x109   :  { %v930_v47 = vpop.f32.mrf.mxu1  ;;  %v880_v1 = vadd.f32 %v879_v46, %v206_v55  ;;  %v929_v4 = vadd.f32 %v928_v45, %v878_v62  ;;  %v210_v46 = vrot.slane %v197_v49, %v209_v42 }
 0x10a   :  { %v883_v51 = vpop.f32.mrf.mxu0 }
 0x10b   :  { %v934_v52 = vpop.f32.mrf.mxu1  ;;  %v931_v7 = vadd.f32 %v930_v47, %v880_v1  ;;  %v884_v11 = vadd.f32 %v883_v51, %v202_v56 }
 0x10c   :  { %v885_v53 = vpop.f32.mrf.mxu0 }
 0x10d   :  { %v936_v54 = vpop.f32.mrf.mxu1  ;;  %v886_v8 = vadd.f32 %v885_v53, %v206_v55  ;;  %v935_v20 = vadd.f32 %v934_v52, %v884_v11 }
 0x10e   :  { %v887_v57 = vpop.f32.mrf.mxu0 }
 0x10f   :  { %v938_v58 = vpop.f32.mrf.mxu1  ;;  %v937_v17 = vadd.f32 %v936_v54, %v886_v8 }
 0x110   :  { %v888_v59 = vpop.f32.mrf.mxu0 }
 0x111   :  { %v939_v60 = vpop.f32.mrf.mxu1 }
 0x112   :  { %v975_v0 = vpop.f32.mrf.mxu0 }
 0x113   :  { %v976_v12 = vadd.f32 %v975_v0, %v925_v5 }
 0x114   :  { %v977_v2 = vpop.f32.mrf.mxu0 }
 0x115   :  { %v978_v9 = vadd.f32 %v977_v2, %v927_v3  ;;  %v1136_v21 = vmax.f32 %v976_v12, 0.0 }
 0x116   :  { %v979_v6 = vpop.f32.mrf.mxu0 }
 0x117   :  { %v980_v10 = vadd.f32 %v979_v6, %v929_v4  ;;  %v1137_v18 = vmax.f32 %v978_v9, 0.0 }
 0x118   :  { %v981_v13 = vpop.f32.mrf.mxu0 }
 0x119   :  { %v982_v14 = vadd.f32 %v981_v13, %v931_v7  ;;  %v1139_v15 = vmax.f32 %v980_v10, 0.0 }
 0x11a   :  { %v985_v16 = vpop.f32.mrf.mxu0 }
 0x11b   :  { %v1140_v19 = vmax.f32 %v982_v14, 0.0  ;;  %v1148_v26 = vpack.c.bf16 %v1139_v15, %v1136_v21  ;;  %v986_v27 = vadd.f32 %v985_v16, %v935_v20  ;;  %v3280_v15 = vld [vmem:[%s3508_s9 + $0x70] sm:$0xff]  ;;  %v3285_v16 = vld [vmem:[%s3508_s9 + $0x68] sm:$0xff] }
 0x11c   :  { %v987_v22 = vpop.f32.mrf.mxu0  ;;  %v3304_v20 = vld [vmem:[%s3508_s9 + $0x50] sm:$0xff]  ;;  %v3310_v21 = vld [vmem:[%s3508_s9 + $0x48] sm:$0xff] }
 0x11d   :  { %v1149_v24 = vpack.c.bf16 %v1140_v19, %v1137_v18  ;;  %v988_v25 = vadd.f32 %v987_v22, %v937_v17  ;;  %v1142_v33 = vmax.f32 %v986_v27, 0.0  ;;  %v3291_v17 = vld [vmem:[%s3508_s9 + $0x60] sm:$0xff]  ;;  %v3297_v18 = vld [vmem:[%s3508_s9 + $0x58] sm:$0xff] }
 0x11e   :  { %v989_v28 = vpop.f32.mrf.mxu0  ;;  %v3322_v22 = vld [vmem:[%s3508_s9 + $0x38] sm:$0xff]  ;;  %v3341_v27 = vld [vmem:[%s3508_s9 + $0x20] sm:$0xff] }
 0x11f   :  { %v1143_v30 = vmax.f32 %v988_v25, 0.0  ;;  %1504 = vmatprep.mubr.bf16.mxu0 %v1149_v24  ;;  %v1151_v37 = vpack.c.bf16 %v1142_v33, %v1142_v33  ;;  %v3328_v25 = vld [vmem:[%s3508_s9 + $0x30] sm:$0xff]  ;;  %v3347_v28 = vld [vmem:[%s3508_s9 + $0x18] sm:$0xff]  ;;  %v1614_v33 = vld [vmem:[%s3511_s2] sm:$0xff] }
 0x120   :  { %1505 = vmatmul.mubr.bf16.vlgmr.msra.gmra.mxu0 %v1148_v26  ;;  %v990_v31 = vpop.f32.mrf.mxu0  ;;  %v3334_v26 = vld [vmem:[%s3508_s9 + $0x28] sm:$0xff] }
 0x121   :  { %v1152_v32 = vpack.c.bf16 %v1143_v30, %v1143_v30  ;;  %v3354_v30 = vld [vmem:[%s3508_s9 + $0x10] sm:$0xff]  ;;  %v3360_v31 = vld [vmem:[%s3508_s9 + $0x8] sm:$0xff] }
 0x123   :  { %v2321_v34 = vpop.f32.mrf.mxu1  ;;  %1514 = vmatprep.mubr.bf16.mxu0 %v1152_v32  ;;  %v3366_v32 = vld [vmem:[%s3508_s9] sm:$0xff] }
 0x125   :  { %v2322_v35 = vpop.f32.mrf.mxu1 }
 0x126   :  { %v2323_v47 = vadd.f32 %v2322_v35, %v2321_v34 }
 0x127   :  { %v2324_v38 = vpop.f32.mrf.mxu1 }
 0x128   :  { %1515 = vmatmul.mubr.bf16.gmra.mxu0 %v1151_v37  ;;  %v1027_v55 = vadd.f32 %v2323_v47, %v210_v46 }
 0x129   :  { %v2325_v39 = vpop.f32.mrf.mxu1 }
 0x12a   :  { %v2326_v56 = vadd.f32 %v2325_v39, %v2324_v38 }
 0x12b   :  { %v2327_v40 = vpop.f32.mrf.mxu1 }
 0x12c   :  { %v1030_v62 = vadd.f32 %v2326_v56, %v210_v46 }
 0x12d   :  { %v2328_v41 = vpop.f32.mrf.mxu1 }
 0x12e   :  { %v2329_v63 = vadd.f32 %v2328_v41, %v2327_v40 }
 0x12f   :  { %v2330_v44 = vpop.f32.mrf.mxu1 }
 0x130   :  { %v1035_v5 = vadd.f32 %v2329_v63, %v210_v46 }
 0x131   :  { %v2331_v45 = vpop.f32.mrf.mxu1 }
 0x132   :  { %v2349_v51 = vpop.f32.mrf.mxu0 }
 0x133   :  { %v2383_v52 = vpop.f32.mrf.mxu1 }
 0x134   :  { %v2350_v53 = vpop.f32.mrf.mxu0 }
 0x135   :  { %v1122_v54 = vpop.f32.mrf.mxu1  ;;  %v2351_v57 = vadd.f32 %v2350_v53, %v2349_v51 }
 0x136   :  { %v2352_v58 = vpop.f32.mrf.mxu0 }
 0x137   :  { %v2384_v59 = vpop.f32.mrf.mxu1  ;;  %v1075_v60 = vadd.f32 %v2351_v57, %v1027_v55 }
 0x138   :  { %v2353_v61 = vpop.f32.mrf.mxu0 }
 0x139   :  { %v2354_v0 = vadd.f32 %v2353_v61, %v2352_v58  ;;  %v1123_v2 = vadd.f32 %v1122_v54, %v1075_v60  ;;  %v1125_v4 = vpop.f32.mrf.mxu1 }
 0x13a   :  { %v2355_v1 = vpop.f32.mrf.mxu0 }
 0x13b   :  { %v1078_v3 = vadd.f32 %v2354_v0, %v1030_v62  ;;  %v1138_v9 = vmax.f32 %v1123_v2, 0.0  ;;  %v1268_v34 = vpop.f32.mrf.mxu1 }
 0x13c   :  { %v2356_v49 = vpop.f32.mrf.mxu0 }
 0x13d   :  { %v1126_v6 = vadd.f32 %v1125_v4, %v1078_v3  ;;  %v2357_v7 = vadd.f32 %v2356_v49, %v2355_v1  ;;  %v1270_v35 = vpop.f32.mrf.mxu1 }
 0x13e   :  { %v2358_v8 = vpop.f32.mrf.mxu0 }
 0x13f   :  { %v1141_v10 = vmax.f32 %v1126_v6, 0.0  ;;  %v1083_v11 = vadd.f32 %v2357_v7, %v1035_v5  ;;  %v1274_v37 = vpop.f32.mrf.mxu1 }
 0x140   :  { %v2359_v12 = vpop.f32.mrf.mxu0 }
 0x141   :  { %v1150_v13 = vpack.c.bf16 %v1141_v10, %v1138_v9  ;;  %v1131_v14 = vadd.f32 %v2383_v52, %v1083_v11  ;;  %v1276_v39 = vpop.f32.mrf.mxu1 }
 0x143   :  { %2287 = vmatmul.mubr.msk.bf16.vlgmr.msra.gmra.mxu1 %vm1465_vm2, %v1150_v13  ;;  %v1144_v19 = vmax.f32 %v1131_v14, 0.0  ;;  %v1280_v42 = vpop.f32.mrf.mxu1 }
 0x144   :  { %1641 = vmatpush1.msra.mxu1 %v3280_v15  ;;  %1565 = vmatprep.mubr.bf16.mxu1 %v2662_v29  ;;  %v3316_v29 = vld [vmem:[%s3508_s9 + $0x40] sm:$0xff] }
 0x145   :  { %1642 = vmatprep.subr.mxu1 %v3285_v16  ;;  %v1153_v24 = vpack.c.bf16 %v1144_v19, %v1144_v19  ;;  %v1282_v46 = vpop.f32.mrf.mxu1 }
 0x146   :  { %1643 = vmatpush1.msra.mxu1 %v3291_v17 }
 0x147   :  { %1644 = vmatprep.subr.mxu1 %v3297_v18 }
 0x148   :  { %1645 = vmatpush1.msra.mxu1 %v3304_v20 }
 0x149   :  { %1646 = vmatprep.subr.mxu1 %v3310_v21 }
 0x14a   :  { %1647 = vmatpush1.msra.mxu1 %v3316_v29 }
 0x14b   :  { %1648 = vmatprep.subr.mxu1 %v3322_v22  ;;  %2288 = vmatmul.mubr.msk.bf16.gmra.mxu1 %vm1465_vm2, %v1153_v24 }
 0x14c   :  { %1649 = vmatpush1.msra.mxu1 %v3328_v25  ;;  %1688 = vmatprep.mubr.f32.mxu1 %v2663_v23 }
 0x14d   :  { %1650 = vmatprep.subr.mxu1 %v3334_v26 }
 0x14e   :  { %1651 = vmatpush1.msra.mxu1 %v3341_v27 }
 0x14f   :  { %1652 = vmatprep.subr.mxu1 %v3347_v28 }
 0x150   :  { %1653 = vmatpush1.msra.mxu1 %v3354_v30 }
 0x151   :  { %1654 = vmatprep.subr.mxu1 %v3360_v31 }
 0x152   :  { %1655 = vmatpush1.msra.mxu1 %v3366_v32 }
 0x153   :  { %2289 = vmatmul.mubr.msk.f32.vlgmr.msra.gmra.mxu1 %vm832_vm0, %v1614_v33  ;;  %1751 = vmatprep.subr.mxu1 %v3258_v36 }
 0x154   :  { %1752 = vmatpush1.msra.mxu1 %v3280_v15  ;;  %1799 = vmatprep.mubr.f32.mxu1 %v2663_v23 }
 0x155   :  { %1753 = vmatprep.subr.mxu1 %v3285_v16 }
 0x156   :  { %1754 = vmatpush1.msra.mxu1 %v3291_v17 }
 0x157   :  { %1755 = vmatprep.subr.mxu1 %v3297_v18 }
 0x158   :  { %1756 = vmatpush1.msra.mxu1 %v3304_v20 }
 0x159   :  { %1757 = vmatprep.subr.mxu1 %v3310_v21 }
 0x15a   :  { %1758 = vmatpush1.msra.mxu1 %v3316_v29 }
 0x15b   :  { %1759 = vmatprep.subr.mxu1 %v3322_v22 }
 0x15c   :  { %1760 = vmatpush1.msra.mxu1 %v3328_v25 }
 0x15d   :  { %1761 = vmatprep.subr.mxu1 %v3334_v26 }
 0x15e   :  { %1762 = vmatpush1.msra.mxu1 %v3341_v27 }
 0x15f   :  { %1763 = vmatprep.subr.mxu1 %v3347_v28 }
 0x160   :  { %1764 = vmatpush1.msra.mxu1 %v3354_v30 }
 0x161   :  { %1765 = vmatprep.subr.mxu1 %v3360_v31 }
 0x162   :  { %1766 = vmatpush1.msra.mxu1 %v3366_v32 }
 0x163   :  { %1859 = vmatprep.subr.mxu1 %v3258_v36  ;;  %v1574_v36 = vld [vmem:[%s3512_s8] sm:$0x3] }
 0x164   :  { %v1579_v60 = vrot.slane %v1574_v36, %v201_v50  ;;  %v1583_v0 = vrot.slane %v1574_v36, %v205_v48 }
 0x1e0   :  { %v1506_v38 = vpop.f32.mrf.mxu0 }
 0x1e1   :  { %v1507_v3 = vadd.f32 %v1506_v38, %v1268_v34 }
 0x1e2   :  { %v1508_v40 = vpop.f32.mrf.mxu0 }
 0x1e3   :  { %v1509_v13 = vadd.f32 %v1508_v40, %v1270_v35 }
 0x1e4   :  { %v1510_v41 = vpop.f32.mrf.mxu0 }
 0x1e5   :  { %v1511_v56 = vadd.f32 %v1510_v41, %v1274_v37 }
 0x1e6   :  { %v1512_v44 = vpop.f32.mrf.mxu0 }
 0x1e7   :  { %v1513_v58 = vadd.f32 %v1512_v44, %v1276_v39 }
 0x1e8   :  { %v1516_v45 = vpop.f32.mrf.mxu0 }
 0x1e9   :  { %v1517_v62 = vadd.f32 %v1516_v45, %v1280_v42  ;;  %v1712_v45 = vpop.permute.xlu0 %1711 }
 0x1ea   :  { %v1518_v47 = vpop.f32.mrf.mxu0 }
 0x1eb   :  { %v1519_v51 = vadd.f32 %v1518_v47, %v1282_v46 }
 0x1ec   :  { %v1520_v52 = vpop.f32.mrf.mxu0 }
 0x1ee   :  { %v1521_v53 = vpop.f32.mrf.mxu0 }
 0x203   :  { %v1557_v54 = vpop.f32.mrf.mxu1 }
 0x204   :  { %v1558_v6 = vadd.f32 %v1557_v54, %v1507_v3 }
 0x205   :  { %v1559_v55 = vpop.f32.mrf.mxu1 }
 0x206   :  { %v1586_v11 = vadd.f32 %v1579_v60, %v1558_v6  ;;  %v1560_v14 = vadd.f32 %v1559_v55, %v1509_v13  ;;  %v2610_v6 = vld [vmem:[%s3513_s10 + $0x18] sm:$0xff]  }
 0x207   :  { %v1561_v57 = vpop.f32.mrf.mxu1  ;;  %2385 = vmatprep.subr.bf16.mxu0 %v2610_v6 }
 0x208   :  { %v1562_v59 = vadd.f32 %v1561_v57, %v1511_v56  ;;  %v1587_v24 = vadd.f32 %v1583_v0, %v1560_v14  ;;  %2386 = vmatpush3.bf16.msra.mxu0 %v2610_v6 }
 0x209   :  { %v1563_v61 = vpop.f32.mrf.mxu1 }
 0x20a   :  { %v1564_v63 = vadd.f32 %v1563_v61, %v1513_v58  ;;  %v3400_v1 = vadd.f32 %v1579_v60, %v1562_v59 }
 0x20b   :  { %v1567_v2 = vpop.f32.mrf.mxu1 }
 0x20c   :  { %v1568_v4 = vadd.f32 %v1567_v2, %v1517_v62  ;;  %v3402_v49 = vadd.f32 %v1583_v0, %v1564_v63 }
 0x20d   :  { %v1569_v5 = vpop.f32.mrf.mxu1 }
 0x20e   :  { %v1570_v7 = vadd.f32 %v1569_v5, %v1519_v51  ;;  %v3404_v8 = vadd.f32 %v1579_v60, %v1568_v4 }
 0x20f   :  { %v1571_v9 = vpop.f32.mrf.mxu1 }
 0x210   :  { %v3406_v50 = vadd.f32 %v1583_v0, %v1570_v7  ;;  %v2611_v7 = vld [vmem:[%s3513_s10 + $0x10] sm:$0xff]  }
 0x211   :  { %v1572_v10 = vpop.f32.mrf.mxu1  ;;  %2387 = vmatprep.subr.bf16.mxu0 %v2611_v7 }
 0x212   :  { %2388 = vmatpush3.bf16.msra.mxu0 %v2611_v7 }
 0x213   :  { %v1690_v12 = vpop.f32.mrf.mxu1 }
 0x214   :  { %v1695_v43 = vadd.f32 %v1690_v12, %v1586_v11 }
 0x215   :  { %v1692_v19 = vpop.f32.mrf.mxu1 }
 0x216   :  { %v2290_v48 = vmul.f32 -1.442695, %v1695_v43  ;;  %v1696_v33 = vadd.f32 %v1692_v19, %v1587_v24  ;;  %v2612_v43 = vld [vmem:[%s3513_s10 + $0x8] sm:$0xff]  }
 0x217   :  { %2389 = vmatprep.subr.bf16.mxu0 %v2612_v43 }
 0x218   :  { %2614 = vpow2.f32 %v2290_v48  ;;  %v2291_v42 = vmul.f32 -1.442695, %v1696_v33  ;;  %v2613_v48 = vld [vmem:[%s3513_s10] sm:$0xff]   ;;  %2390 = vmatpush3.bf16.msra.mxu0 %v2612_v43 }
 0x219   :  { %2616 = vtanh.f32 %v1696_v33  ;;  %2391 = vmatprep.subr.bf16.mxu0 %v2613_v48 }
 0x21c   :  { %2392 = vmatpush3.bf16.msra.mxu0 %v2613_v48 }
 0x225   :  { %v2615_v34 = vpop.eup %2614 }
 0x226   :  { %v1700_v37 = vadd.f32 1.0, %v2615_v34  ;;  %v2617_v38 = vpop.eup %2616 }
 0x228   :  { %2618 = vrcp.f32 %v1700_v37 }
 0x229   :  { %2620 = vpow2.f32 %v2291_v42 }
 0x235   :  { %v2619_v39 = vpop.eup %2618 }
 0x236   :  { %v1715_v41 = vmul.f32 %v2619_v39, %v2617_v38  ;;  %v2621_v44 = vpop.eup %2620  ;;  %v1714_v47 = vmul.f32 %v2619_v39, %v1712_v45  ;;  %v2298_v39 = vld [vmem:[%s3515_s11] ss:$0 sm:$0xff] }
 0x237   :  { %v1707_v46 = vadd.f32 1.0, %v2621_v44 }
 0x238   :  { %1717 = vrot.lane.b32.xlu0 %v1715_v41, %s2664_s0 }
 0x239   :  { %2622 = vrcp.f32 %v1707_v46 }
 0x246   :  { %v2623_v51 = vpop.eup %2622 }
 0x2aa   :  { %v1718_v35 = vpop.permute.xlu0 %1717 }
 0x2ab   :  { %v1720_v40 = vadd.f32 %v1718_v35, %v1714_v47 }
 0x2ad   :  { %2624 = vtanh.f32 %v1720_v40 }
 0x2ba   :  { %v2625_v52 = vpop.eup %2624 }
 0x2bb   :  { %v1722_v53 = vmul.f32 %v2625_v52, %v2623_v51 }
 0x2bd   :  { %1724 = vrot.lane.b32.xlu1 %v1722_v53, %s2664_s0 }
 0x32f   :  { %v1725_v54 = vpop.permute.xlu1 %1724 }
 0x330   :  { %1727 = vst.msk [vmem:[#allocation3] sm:$0xff] %vm832_vm0, %v1725_v54  ;;  %2292 = vmatmul.mubr.msk.f32.vlgmr.msra.gmra.mxu1 %vm832_vm0, %v1725_v54 }
 0x331   :  { %1860 = vmatpush1.msra.mxu1 %v3280_v15  ;;  %1907 = vmatprep.mubr.f32.mxu1 %v2663_v23 }
 0x332   :  { %1861 = vmatprep.subr.mxu1 %v3285_v16 }
 0x333   :  { %1862 = vmatpush1.msra.mxu1 %v3291_v17 }
 0x334   :  { %1863 = vmatprep.subr.mxu1 %v3297_v18 }
 0x335   :  { %1864 = vmatpush1.msra.mxu1 %v3304_v20 }
 0x336   :  { %1865 = vmatprep.subr.mxu1 %v3310_v21 }
 0x337   :  { %1866 = vmatpush1.msra.mxu1 %v3316_v29  ;;  %v3434_v58 = vld [vmem:[#allocation3] sm:$0xff] }
 0x338   :  { %1867 = vmatprep.subr.mxu1 %v3322_v22 }
 0x339   :  { %1868 = vmatpush1.msra.mxu1 %v3328_v25 }
 0x33a   :  { %1869 = vmatprep.subr.mxu1 %v3334_v26 }
 0x33b   :  { %1870 = vmatpush1.msra.mxu1 %v3341_v27 }
 0x33c   :  { %1871 = vmatprep.subr.mxu1 %v3347_v28 }
 0x33d   :  { %1872 = vmatpush1.msra.mxu1 %v3354_v30 }
 0x33e   :  { %1873 = vmatprep.subr.mxu1 %v3360_v31 }
 0x33f   :  { %1874 = vmatpush1.msra.mxu1 %v3366_v32 }
 0x3f0   :  { %v1801_v23 = vpop.f32.mrf.mxu1 }
 0x3f1   :  { %v1806_v15 = vadd.f32 %v1801_v23, %v3400_v1 }
 0x3f2   :  { %v1803_v17 = vpop.f32.mrf.mxu1 }
 0x3f3   :  { %v2293_v16 = vmul.f32 -1.442695, %v1806_v15  ;;  %v1807_v18 = vadd.f32 %v1803_v17, %v3402_v49 }
 0x3f5   :  { %2626 = vpow2.f32 %v2293_v16  ;;  %v2294_v26 = vmul.f32 -1.442695, %v1807_v18 }
 0x3f6   :  { %2628 = vtanh.f32 %v1807_v18 }
 0x402   :  { %v2627_v20 = vpop.eup %2626 }
 0x403   :  { %v1811_v21 = vadd.f32 1.0, %v2627_v20  ;;  %v2629_v29 = vpop.eup %2628 }
 0x405   :  { %2630 = vrcp.f32 %v1811_v21 }
 0x406   :  { %2632 = vpow2.f32 %v2294_v26 }
 0x412   :  { %v2631_v22 = vpop.eup %2630 }
 0x413   :  { %v1822_v25 = vmul.f32 %v2631_v22, %v2629_v29  ;;  %v2633_v27 = vpop.eup %2632  ;;  %v1821_v30 = vmul.f32 %v2631_v22, %v1720_v40 }
 0x414   :  { %v1818_v28 = vadd.f32 1.0, %v2633_v27 }
 0x415   :  { %1824 = vrot.lane.b32.xlu1 %v1822_v25, %s2664_s0 }
 0x416   :  { %2634 = vrcp.f32 %v1818_v28 }
 0x423   :  { %v2635_v55 = vpop.eup %2634 }
 0x487   :  { %v1825_v31 = vpop.permute.xlu1 %1824 }
 0x488   :  { %v1827_v32 = vadd.f32 %v1825_v31, %v1821_v30 }
 0x48a   :  { %2636 = vtanh.f32 %v1827_v32 }
 0x497   :  { %v2637_v36 = vpop.eup %2636 }
 0x498   :  { %v1829_v56 = vmul.f32 %v2637_v36, %v2635_v55 }
 0x49a   :  { %1831 = vrot.lane.b32.xlu0 %v1829_v56, %s2664_s0 }
 0x50c   :  { %v1832_v57 = vpop.permute.xlu0 %1831 }
 0x50d   :  { %1835 = vst.msk [vmem:[#allocation3 + $0x8] sm:$0xff] %vm832_vm0, %v1832_v57  ;;  %2295 = vmatmul.mubr.msk.f32.vlgmr.msra.gmra.mxu1 %vm832_vm0, %v1832_v57 }
 0x514   :  { %v3436_v59 = vld [vmem:[#allocation3 + $0x8] sm:$0xff] }
 0x515   :  { %v1949_v60 = vpack.c.bf16 %v3436_v59, %v3434_v58 }
 0x517   :  { %2393 = vmatprep.mubr.msk.bf16.mxu0 %vm832_vm0, %v1949_v60 }
 0x5cd   :  { %v1909_v61 = vpop.f32.mrf.mxu1 }
 0x5ce   :  { %v1914_v62 = vadd.f32 %v1909_v61, %v3404_v8 }
 0x5cf   :  { %v1911_v0 = vpop.f32.mrf.mxu1 }
 0x5d0   :  { %v2296_v63 = vmul.f32 -1.442695, %v1914_v62  ;;  %v1915_v1 = vadd.f32 %v1911_v0, %v3406_v50 }
 0x5d2   :  { %2638 = vpow2.f32 %v2296_v63  ;;  %v2297_v8 = vmul.f32 -1.442695, %v1915_v1 }
 0x5d3   :  { %2640 = vtanh.f32 %v1915_v1 }
 0x5df   :  { %v2639_v2 = vpop.eup %2638 }
 0x5e0   :  { %v1919_v3 = vadd.f32 1.0, %v2639_v2  ;;  %v2641_v4 = vpop.eup %2640 }
 0x5e2   :  { %2642 = vrcp.f32 %v1919_v3 }
 0x5e3   :  { %2644 = vpow2.f32 %v2297_v8 }
 0x5ef   :  { %v2643_v49 = vpop.eup %2642 }
 0x5f0   :  { %v1930_v5 = vmul.f32 %v2643_v49, %v2641_v4  ;;  %v2645_v9 = vpop.eup %2644  ;;  %v1929_v10 = vmul.f32 %v2643_v49, %v1827_v32 }
 0x5f1   :  { %v1926_v50 = vadd.f32 1.0, %v2645_v9 }
 0x5f2   :  { %1932 = vrot.lane.b32.xlu1 %v1930_v5, %s2664_s0 }
 0x5f3   :  { %2646 = vrcp.f32 %v1926_v50 }
 0x600   :  { %v2647_v13 = vpop.eup %2646 }
 0x664   :  { %v1933_v11 = vpop.permute.xlu1 %1932 }
 0x665   :  { %v1935_v12 = vadd.f32 %v1933_v11, %v1929_v10 }
 0x667   :  { %2648 = vtanh.f32 %v1935_v12 }
 0x674   :  { %v2649_v14 = vpop.eup %2648 }
 0x675   :  { %v1937_v19 = vmul.f32 %v2649_v14, %v2647_v13 }
 0x677   :  { %1939 = vrot.lane.b32.xlu0 %v1937_v19, %s2664_s0 }
 0x6e9   :  { %v1940_v24 = vpop.permute.xlu0 %1939 }
 0x6ea   :  { %1943 = vst.msk [vmem:[#allocation3 + $0x10] sm:$0xff] %vm832_vm0, %v1940_v24  ;;  %v1944_v33 = vsel %vm832_vm0, %v1940_v24, %v1935_v12 }
 0x6eb   :  { %1945 = vst [vmem:[%s3514_s13] sm:$0xff] %v1944_v33 }
 0x6f1   :  { %v3462_v34 = vld [vmem:[#allocation3 + $0x10] sm:$0xff] }
 0x6f2   :  { %v1950_v37 = vpack.c.bf16 %v3462_v34, %v3462_v34 }
 0x6f4   :  { %2394 = vmatmul.mubr.msk.bf16.vlgmr.msra.gmra.mxu0 %vm832_vm0, %v1950_v37 }
 0x7b4   :  { %v2395_v38 = vpop.f32.mrf.mxu0 }
 0x7b5   :  { %v2039_v35 = vadd.f32 %v2395_v38, %v2298_v39 }
 0x7b6   :  { %v2030_v41 = vpop.f32.mrf.mxu0 }
 0x7b7   :  { %v2031_v42 = vadd.f32 %v2298_v39, %v2030_v41  ;;  %v2051_v51 = vsel %vm2044_vm3, %v2039_v35, -inf }
 0x7b8   :  { %v2396_v44 = vpop.f32.mrf.mxu0 }
 0x7b9   :  { %v2045_v45 = vsel %vm2044_vm3, %v2031_v42, -inf }
 0x7ba   :  { %v2033_v46 = vpop.f32.mrf.mxu0  ;;  %2046 = vmax.xlane.f32.xlu1 %v2045_v45 }
 0x7bb   :  { %v2034_v47 = vadd.f32 %v2298_v39, %v2033_v46 }
 0x7bd   :  { %v2048_v40 = vsel %vm2044_vm3, %v2034_v47, -inf }
 0x7be   :  { %2049 = vmax.xlane.f32.xlu0 %v2048_v40 }
 0x7c2   :  { %2052 = vmax.xlane.f32.xlu0 %v2051_v51 }
 0x843   :  { %v2047_v52 = vpop.xlane.xlu1 %2046 }
 0x844   :  { %v2054_v53 = vsub.f32 %v2031_v42, %v2047_v52 }
 0x846   :  { %v2057_v54 = vmul.f32 1.442695, %v2054_v53 }
 0x847   :  { %v2050_v23 = vpop.xlane.xlu0 %2049 }
 0x848   :  { %2650 = vpow2.f32 %v2057_v54  ;;  %v2055_v15 = vsub.f32 %v2034_v47, %v2050_v23 }
 0x84a   :  { %v2059_v16 = vmul.f32 1.442695, %v2055_v15 }
 0x84b   :  { %v2053_v17 = vpop.xlane.xlu0 %2052 }
 0x84c   :  { %2652 = vpow2.f32 %v2059_v16  ;;  %v2056_v18 = vsub.f32 %v2039_v35, %v2053_v17 }
 0x84e   :  { %v2061_v20 = vmul.f32 1.442695, %v2056_v18 }
 0x850   :  { %2654 = vpow2.f32 %v2061_v20 }
 0x855   :  { %v2651_v21 = vpop.eup %2650 }
 0x856   :  { %v2063_v29 = vsel %vm2044_vm3, %v2651_v21, 0.0 }
 0x857   :  { %2064 = vadd.xlane.f32.xlu1 %v2063_v29 }
 0x859   :  { %v2653_v22 = vpop.eup %2652 }
 0x85a   :  { %v2066_v25 = vsel %vm2044_vm3, %v2653_v22, 0.0 }
 0x85b   :  { %2067 = vadd.xlane.f32.xlu0 %v2066_v25 }
 0x85d   :  { %v2655_v26 = vpop.eup %2654 }
 0x85e   :  { %v2069_v27 = vsel %vm2044_vm3, %v2655_v26, 0.0 }
 0x85f   :  { %2070 = vadd.xlane.f32.xlu1 %v2069_v27 }
 0x871   :  { %2093 = vrot.lane.b32.xlu0 %v2031_v42, %s2664_s0 }
 0x8e0   :  { %v2065_v28 = vpop.xlane.xlu1 %2064 }
 0x8e1   :  { %2656 = vrcp.f32 %v2065_v28 }
 0x8e4   :  { %v2068_v30 = vpop.xlane.xlu0 %2067 }
 0x8e8   :  { %v2071_v31 = vpop.xlane.xlu1 %2070  ;;  %v2094_v61 = vpop.permute.xlu0 %2093 }
 0x8e9   :  { %2658 = vrcp.f32 %v2071_v31 }
 0x8ea   :  { %2660 = vrcp.f32 %v2068_v30 }
 0x8ee   :  { %v2657_v32 = vpop.eup %2656 }
 0x8ef   :  { %v2073_v55 = vmul.f32 %v2657_v32, %v2651_v21 }
 0x8f1   :  { %2081 = vrot.lane.b32.xlu0 %v2073_v55, %s2664_s0 }
 0x8f5   :  { %2097 = vrot.lane.b32.xlu0 %v2039_v35, %s2664_s0 }
 0x8f6   :  { %v2659_v36 = vpop.eup %2658 }
 0x8f7   :  { %v2077_v56 = vmul.f32 %v2659_v36, %v2655_v26  ;;  %v2661_v57 = vpop.eup %2660 }
 0x8f8   :  { %v2075_v60 = vmul.f32 %v2661_v57, %v2653_v22 }
 0x8f9   :  { %2085 = vrot.lane.b32.xlu1 %v2077_v56, %s2664_s0 }
 0x8fd   :  { %2083 = vrot.lane.b32.xlu1 %v2075_v60, %s2664_s0 }
 0x901   :  { %2095 = vrot.lane.b32.xlu1 %v2034_v47, %s2664_s0 }
 0x963   :  { %v2082_v62 = vpop.permute.xlu0 %2081 }
 0x964   :  { %v2102_v63 = vsel %vm832_vm0, %v3434_v58, %v2082_v62 }
 0x965   :  { %v2106_v0 = vsel %vm2105_vm4, %v2102_v63, %v2094_v61 }
 0x966   :  { %v2110_v1 = vsel %vm2109_vm5, %v2106_v0, 0.0 }
 0x967   :  { %2113 = vst [vmem:[%s3516_s12] sm:$0xff] %v2110_v1  ;;  %v2098_v3 = vpop.permute.xlu0 %2097 }
 0x96b   :  { %v2086_v2 = vpop.permute.xlu1 %2085 }
 0x96c   :  { %v2104_v4 = vsel %vm832_vm0, %v3462_v34, %v2086_v2 }
 0x96d   :  { %v2108_v49 = vsel %vm2105_vm4, %v2104_v4, %v2098_v3 }
 0x96e   :  { %v2112_v5 = vsel %vm2109_vm5, %v2108_v49, 0.0 }
 0x96f   :  { %2115 = vst [vmem:[%s3516_s12 + $0x10] sm:$0xff] %v2112_v5  ;;  %v2084_v58 = vpop.permute.xlu1 %2083 }
 0x970   :  { %v2103_v6 = vsel %vm832_vm0, %v3436_v59, %v2084_v58 }
 0x973   :  { %v2096_v7 = vpop.permute.xlu1 %2095 }
 0x974   :  { %v2107_v8 = vsel %vm2105_vm4, %v2103_v6, %v2096_v7 }
 0x975   :  { %v2111_v9 = vsel %vm2109_vm5, %v2107_v8, 0.0 }
 0x976   :  { %2114 = vst [vmem:[%s3516_s12 + $0x8] sm:$0xff] %v2111_v9 }

</bundles_post_ra>
